<compile_context>
chip_gen: v6e
topology: v6e:2x2x1
jax: 0.10.0
libtpu: 0.0.40
codegen_flags: <defaults>
</compile_context>

<pallas_src>
import jax
import jax.numpy as jnp
from jax import lax
from jax.experimental import pallas as pl
from jax.experimental.pallas import tpu as pltpu
import numpy as np

E = 300          # embedding size
E_PAD = 384      # padded contraction: 300 emb cols + 1 bias col + zeros (= 3 * 128)
H = 128          # GRU hidden (hid1)
O = 128          # conv out channels (hid2)
MAX_CHUNK = 512  # x rows processed per grid step (pipelined HBM -> VMEM)


def _round_up(x, m):
    return (x + m - 1) // m * m


# --------------------------------------------------------------------------
# Fused kernel: projection + biGRU + Conv1d(k=2) + ReLU + max + Linear(O -> 1)
# --------------------------------------------------------------------------
def _make_fused_kernel(T, N, chunk):
    TN = T * N
    H3, H6 = 3 * H, 6 * H

    def kernel(x_ref, wih_ref, whh_ref, bhn_f_ref, bhn_b_ref,
               wc0_ref, wc1_ref, bc_ref, wl_ref, bl_ref,
               o_ref, gi_ref, y_ref):
        c = pl.program_id(0)

        # ---- stage 1: input projection for this chunk of rows (bf16 MXU, f32 acc) ----
        # Input biases are folded into row E of wih (x carries a constant 1.0 in col E).
        gi_ref[pl.ds(c * chunk, chunk), :] = jnp.dot(
            x_ref[...], wih_ref[...], preferred_element_type=jnp.float32)

        # ---- stage 2: recurrence + conv + pool + linear, once all gi chunks are done ----
        @pl.when(c == pl.num_programs(0) - 1)
        def _():
            whh = whh_ref[...]            # (2H, 6H) block-diag [whh_f.T ; whh_b.T], f32
            bhn_f = bhn_f_ref[...]        # (1, H)  recurrent bias of the n gate (r-gated)
            bhn_b = bhn_b_ref[...]

            def gates(gi, gh, bhn, h_prev):
                r = jax.nn.sigmoid(gi[:, 0:H] + gh[:, 0:H])
                z = jax.nn.sigmoid(gi[:, H:2 * H] + gh[:, H:2 * H])
                n = jnp.tanh(gi[:, 2 * H:H3] + r * (gh[:, 2 * H:H3] + bhn))
                return n + z * (h_prev - n)            # == (1 - z) * n + z * h_prev

            def first(gi, bhn):                        # h_prev == 0 -> no h-matmul
                r = jax.nn.sigmoid(gi[:, 0:H])
                z = jax.nn.sigmoid(gi[:, H:2 * H])
                n = jnp.tanh(gi[:, 2 * H:H3] + r * bhn)
                return n - z * n

            # step 0 peeled, forward / backward interleaved
            h_f = first(gi_ref[0:N, 0:H3], bhn_f)
            h_b = first(gi_ref[(T - 1) * N:T * N, H3:H6], bhn_b)
            y_ref[0:N, 0:H] = h_f.astype(y_ref.dtype)
            y_ref[(T - 1) * N:T * N, H:2 * H] = h_b.astype(y_ref.dtype)

            # remaining T-1 steps: fori_loop, hidden states streamed into the y scratch
            def body(i, carry):
                h_f, h_b = carry
                rf = pl.multiple_of(i * N, N)
                rb = pl.multiple_of((T - 1 - i) * N, N)
                gi_f = gi_ref[pl.ds(rf, N), 0:H3]
                gi_b = gi_ref[pl.ds(rb, N), H3:H6]
                # fused fwd+bwd hidden matmul: (N, 2H) @ block-diag(2H, 6H), f32
                gh = jnp.dot(jnp.concatenate([h_f, h_b], axis=1), whh,
                             preferred_element_type=jnp.float32)
                h_f = gates(gi_f, gh[:, 0:H3], bhn_f, h_f)
                h_b = gates(gi_b, gh[:, H3:H6], bhn_b, h_b)
                y_ref[pl.ds(rf, N), 0:H] = h_f.astype(y_ref.dtype)
                y_ref[pl.ds(rb, N), H:2 * H] = h_b.astype(y_ref.dtype)
                return h_f, h_b

            lax.fori_loop(1, T, body, (h_f, h_b))

            # zero the halo rows read by the shifted conv operand (they are masked anyway)
            y_ref[pl.ds(TN, 8), :] = jnp.zeros((8, 2 * H), y_ref.dtype)

            # ---- Conv1d(k=2) as two bf16 matmuls over the whole (T*N, 2H) buffer ----
            conv = (jnp.dot(y_ref[0:TN, :], wc0_ref[...],
                            preferred_element_type=jnp.float32)
                    + jnp.dot(y_ref[pl.ds(1, TN), :], wc1_ref[...],   # +1-row shifted read
                              preferred_element_type=jnp.float32)
                    + bc_ref[...])
            conv = jnp.maximum(conv, 0.0)                              # ReLU

            # mask the invalid last position of each batch element (post-ReLU, so 0 is the
            # identity of the max) and reduce with one vectorized max over the length axis.
            conv = conv.reshape(T, N, O)
            s_idx = lax.broadcasted_iota(jnp.int32, (T, N, O), 1)
            conv = jnp.where(s_idx != (N - 1), conv, 0.0)
            pooled = jnp.max(conv, axis=1)                             # (T, O)

            o_ref[...] = (jnp.dot(pooled, wl_ref[...],
                                  preferred_element_type=jnp.float32)
                          + bl_ref[...])                               # (T, 1)

    return kernel


def fused_gru_cnn_pallas(x, p, T, N, chunk):
    """x: (num_chunks*chunk, E_PAD) bf16 embedded input (row-padded).  Returns (T, 1) f32."""
    TN = T * N
    rows = x.shape[0]
    num_chunks = rows // chunk

    def rep(shape):                       # full array, resident across the grid
        nd = len(shape)
        return pl.BlockSpec(shape, lambda c, _nd=nd: (0,) * _nd)

    return pl.pallas_call(
        _make_fused_kernel(T, N, chunk),
        grid=(num_chunks,),
        in_specs=[
            pl.BlockSpec((chunk, E_PAD), lambda c: (c, 0)),   # x: chunked, double-buffered DMA
            rep((E_PAD, 6 * H)),                              # [wih_f.T | wih_b.T] + bias row (bf16)
            rep((2 * H, 6 * H)),                              # block-diag recurrent weights (f32)
            rep((1, H)), rep((1, H)),                         # b_hn fwd / bwd
            rep((2 * H, O)), rep((2 * H, O)),                 # conv taps k=0, k=1 (bf16)
            rep((1, O)),                                      # conv bias
            rep((O, 1)), rep((1, 1)),                         # linear
        ],
        out_specs=rep((T, 1)),
        out_shape=jax.ShapeDtypeStruct((T, 1), jnp.float32),
        scratch_shapes=[
            pltpu.VMEM((rows, 6 * H), jnp.float32),           # gi: projected gates, all steps
            pltpu.VMEM((TN + 8, 2 * H), jnp.bfloat16),        # y: biGRU outputs (+ halo rows)
        ],
        compiler_params=pltpu.CompilerParams(
            dimension_semantics=("arbitrary",),
            vmem_limit_bytes=64 * 1024 * 1024),
    )(x, p["wih_cat"], p["whh_bd"], p["bhn_f"], p["bhn_b"],
      p["wc0_T"], p["wc1_T"], p["bc2"], p["wl_T"], p["bl2"])


# --------------------------------------------------------------------------
# One-time parameter preparation (transposes / bias folding / padding / bf16)
# --------------------------------------------------------------------------
def prepare_params(p):
    # Embedding padded to E_PAD with a constant-1.0 "bias" column at index E.
    emb = jnp.pad(p["emb"], ((0, 0), (0, E_PAD - E)))
    emb = emb.at[:, E].set(1.0).astype(jnp.bfloat16)

    def comb_bias(bih, bhh):
        # fold b_hr into b_ir and b_hz into b_iz; keep b_hn separate (it is r-gated)
        return jnp.concatenate([bih[:H] + bhh[:H],
                                bih[H:2 * H] + bhh[H:2 * H],
                                bih[2 * H:]])

    wih = jnp.concatenate([p["wih_f"].T, p["wih_b"].T], axis=1)          # (E, 6H)
    bias_row = jnp.concatenate([comb_bias(p["bih_f"], p["bhh_f"]),
                                comb_bias(p["bih_b"], p["bhh_b"])]).reshape(1, 6 * H)
    wih_cat = jnp.concatenate(
        [wih, bias_row, jnp.zeros((E_PAD - E - 1, 6 * H), jnp.float32)],
        axis=0).astype(jnp.bfloat16)                                     # (E_PAD, 6H)

    zeros_h3h = jnp.zeros((H, 3 * H), jnp.float32)
    whh_bd = jnp.concatenate(
        [jnp.concatenate([p["whh_f"].T, zeros_h3h], axis=1),
         jnp.concatenate([zeros_h3h, p["whh_b"].T], axis=1)], axis=0)    # (2H, 6H) f32

    return {
        "emb": emb,
        "wih_cat": wih_cat,
        "whh_bd": whh_bd,
        "bhn_f": p["bhh_f"][2 * H:].reshape(1, H),
        "bhn_b": p["bhh_b"][2 * H:].reshape(1, H),
        "wc0_T": p["wc"][:, :, 0].T.astype(jnp.bfloat16),
        "wc1_T": p["wc"][:, :, 1].T.astype(jnp.bfloat16),
        "bc2": p["bc"].reshape(1, O),
        "wl_T": p["wl"].T, "bl2": p["bl"].reshape(1, 1),
    }


# --------------------------------------------------------------------------
# Full forward (glue: embedding gather + row padding only)
# --------------------------------------------------------------------------
def gru_cnn_forward(src, prep):
    T, N = src.shape                       # GRU: time = src axis 0 (B), batch = axis 1 (S)
    TN = T * N
    chunk = min(MAX_CHUNK, _round_up(TN, 8))
    num_chunks = -(-TN // chunk)
    x = prep["emb"][src.reshape(TN)]       # (TN, E_PAD) bf16 gather; dropout = identity (eval)
    pad_rows = num_chunks * chunk - TN
    if pad_rows:
        x = jnp.pad(x, ((0, pad_rows), (0, 0)))
    return fused_gru_cnn_pallas(x, prep, T, N, chunk)   # (B, 1)


# --------------------------------------------------------------------------
# Pure-JAX reference (mirrors PyTorch semantics, all f32) for verification
# --------------------------------------------------------------------------
def ref_forward(src, p):
    x = p["emb"][src]                      # (B, S, E); GRU time axis = 0

    def run_dir(wih, whh, bih, bhh, reverse):
        T, N = x.shape[0], x.shape[1]
        h = jnp.zeros((N, H), jnp.float32)
        outs = [None] * T
        order = range(T - 1, -1, -1) if reverse else range(T)
        for t in order:
            gi = x[t] @ wih.T + bih
            gh = h @ whh.T + bhh
            r = jax.nn.sigmoid(gi[:, :H] + gh[:, :H])
            z = jax.nn.sigmoid(gi[:, H:2 * H] + gh[:, H:2 * H])
            n = jnp.tanh(gi[:, 2 * H:] + r * gh[:, 2 * H:])
            h = (1.0 - z) * n + z * h
            outs[t] = h
        return jnp.stack(outs, axis=0)

    of = run_dir(p["wih_f"], p["whh_f"], p["bih_f"], p["bhh_f"], False)
    ob = run_dir(p["wih_b"], p["whh_b"], p["bih_b"], p["bhh_b"], True)
    y = jnp.concatenate([of, ob], axis=-1)        # (B, S, 2H)
    c = (jnp.einsum("bsc,oc->bso", y[:, :-1, :], p["wc"][:, :, 0])
         + jnp.einsum("bsc,oc->bso", y[:, 1:, :], p["wc"][:, :, 1])
         + p["bc"])
    c = jnp.maximum(c, 0.0)
    pooled = jnp.max(c, axis=1)                   # (B, O)
    return pooled @ p["wl"].T + p["bl"]           # (B, 1)


# --------------------------------------------------------------------------
# Deterministic parameter init (PyTorch-like shapes)
# --------------------------------------------------------------------------
def init_params(key, vocab):
    ks = jax.random.split(key, 13)
    u = lambda k, shape, s: jax.random.uniform(k, shape, jnp.float32, -s, s)
    emb = jax.random.normal(ks[0], (vocab, E), jnp.float32) * 0.1
    emb = emb.at[0].set(0.0)                      # padding_idx=0
    sH = 1.0 / float(np.sqrt(H))
    sC = 1.0 / float(np.sqrt(2 * H * 2))
    sL = 1.0 / float(np.sqrt(O))
    return {
        "emb": emb,
        "wih_f": u(ks[1], (3 * H, E), sH), "whh_f": u(ks[2], (3 * H, H), sH),
        "bih_f": u(ks[3], (3 * H,), sH), "bhh_f": u(ks[4], (3 * H,), sH),
        "wih_b": u(ks[5], (3 * H, E), sH), "whh_b": u(ks[6], (3 * H, H), sH),
        "bih_b": u(ks[7], (3 * H,), sH), "bhh_b": u(ks[8], (3 * H,), sH),
        "wc": u(ks[9], (O, 2 * H, 2), sC), "bc": u(ks[10], (O,), sC),
        "wl": u(ks[11], (1, O), sL), "bl": u(ks[12], (1,), sL),
    }


if __name__ == "__main__":
    key = jax.random.PRNGKey(0)
    kp, ksrc = jax.random.split(key)
    vocab = 50
    B, S = 2, 8          # B -> GRU time axis, S -> GRU batch / conv length axis
    params = init_params(kp, vocab)
    src = jax.random.randint(ksrc, (B, S), 0, vocab, dtype=jnp.int32)

    prep = prepare_params(params)        # one-time layout prep (outside the jit path)

    fwd = jax.jit(gru_cnn_forward)
    out = jax.block_until_ready(fwd(src, prep))
    assert out.shape == (B, 1) and out.dtype == jnp.float32

    ref = ref_forward(src, params)
    # bf16 MXU operands (projection + conv) -> relaxed tolerance vs. the all-f32 reference.
    np.testing.assert_allclose(np.asarray(out), np.asarray(ref), rtol=2e-2, atol=2e-2)
    print("KERNEL_OK")
</pallas_src>

<mosaic_0001>
module attributes {stable_mosaic.version = 11 : i64} {
  func.func @kernel(%arg0: i32, %arg1: memref<16x384xbf16, #tpu.memory_space<vmem>>, %arg2: memref<384x768xbf16, #tpu.memory_space<vmem>>, %arg3: memref<256x768xf32, #tpu.memory_space<vmem>>, %arg4: memref<1x128xf32, #tpu.memory_space<vmem>>, %arg5: memref<1x128xf32, #tpu.memory_space<vmem>>, %arg6: memref<256x128xbf16, #tpu.memory_space<vmem>>, %arg7: memref<256x128xbf16, #tpu.memory_space<vmem>>, %arg8: memref<1x128xf32, #tpu.memory_space<vmem>>, %arg9: memref<128x1xf32, #tpu.memory_space<vmem>>, %arg10: memref<1x1xf32, #tpu.memory_space<vmem>>, %arg11: memref<2x1xf32, #tpu.memory_space<vmem>>, %arg12: memref<16x768xf32, #tpu.memory_space<vmem>>, %arg13: memref<24x256xbf16, #tpu.memory_space<vmem>>) attributes {dimension_semantics = [#tpu.dimension_semantics<arbitrary>], iteration_bounds = array<i64: 1>, scalar_prefetch = 0 : i64, scratch_operands = 2 : i64, tpu.core_type = #tpu.core_type<tc>, window_params = [{transform_indices = @transform_0, window_bounds = array<i64: 16, 384>}, {pipeline_mode = #tpu.pipeline_mode<synchronous>, transform_indices = @transform_1, window_bounds = array<i64: 384, 768>}, {pipeline_mode = #tpu.pipeline_mode<synchronous>, transform_indices = @transform_2, window_bounds = array<i64: 256, 768>}, {pipeline_mode = #tpu.pipeline_mode<synchronous>, transform_indices = @transform_3, window_bounds = array<i64: 1, 128>}, {pipeline_mode = #tpu.pipeline_mode<synchronous>, transform_indices = @transform_4, window_bounds = array<i64: 1, 128>}, {pipeline_mode = #tpu.pipeline_mode<synchronous>, transform_indices = @transform_5, window_bounds = array<i64: 256, 128>}, {pipeline_mode = #tpu.pipeline_mode<synchronous>, transform_indices = @transform_6, window_bounds = array<i64: 256, 128>}, {pipeline_mode = #tpu.pipeline_mode<synchronous>, transform_indices = @transform_7, window_bounds = array<i64: 1, 128>}, {pipeline_mode = #tpu.pipeline_mode<synchronous>, transform_indices = @transform_8, window_bounds = array<i64: 128, 1>}, {pipeline_mode = #tpu.pipeline_mode<synchronous>, transform_indices = @transform_9, window_bounds = array<i64: 1, 1>}, {pipeline_mode = #tpu.pipeline_mode<synchronous>, transform_indices = @transform_10, window_bounds = array<i64: 2, 1>}]} {
    %c0 = arith.constant 0 : index
    %c0_0 = arith.constant 0 : index
    %0 = vector.load %arg1[%c0, %c0_0] : memref<16x384xbf16, #tpu.memory_space<vmem>>, vector<16x384xbf16>
    %c0_1 = arith.constant 0 : index
    %c0_2 = arith.constant 0 : index
    %1 = vector.load %arg2[%c0_1, %c0_2] : memref<384x768xbf16, #tpu.memory_space<vmem>>, vector<384x768xbf16>
    %cst = arith.constant dense<0.000000e+00> : vector<16x768xf32>
    %2 = tpu.matmul %0, %1, %cst {dimension_numbers = #tpu.dot_dimension_numbers<[1], [0], [0], [1], [0, 0, 1, 1], [], []>} : vector<16x384xbf16>, vector<384x768xbf16>, vector<16x768xf32> -> vector<16x768xf32>
    %c16_i32 = arith.constant 16 : i32
    %3 = arith.muli %arg0, %c16_i32 : i32
    %4 = arith.index_cast %3 : i32 to index
    %c0_3 = arith.constant 0 : index
    %5 = vector.load %arg12[%4, %c0_3] : memref<16x768xf32, #tpu.memory_space<vmem>>, vector<16x768xf32>
    tpu.vector_store %arg12[%4, %c0_3], %2 {strides = array<i32>} : memref<16x768xf32, #tpu.memory_space<vmem>>, vector<16x768xf32>,
    %c0_i32 = arith.constant 0 : i32
    %6 = arith.cmpi eq, %arg0, %c0_i32 : i32
    %7 = arith.extui %6 : i1 to i32
    %c0_i32_4 = arith.constant 0 : i32
    %8 = arith.cmpi ne, %7, %c0_i32_4 : i32
    scf.if %8 {
      %c0_5 = arith.constant 0 : index
      %c0_6 = arith.constant 0 : index
      %9 = vector.load %arg3[%c0_5, %c0_6] : memref<256x768xf32, #tpu.memory_space<vmem>>, vector<256x768xf32>
      %c0_7 = arith.constant 0 : index
      %c0_8 = arith.constant 0 : index
      %10 = vector.load %arg4[%c0_7, %c0_8] : memref<1x128xf32, #tpu.memory_space<vmem>>, vector<1x128xf32>
      %c0_9 = arith.constant 0 : index
      %c0_10 = arith.constant 0 : index
      %11 = vector.load %arg5[%c0_9, %c0_10] : memref<1x128xf32, #tpu.memory_space<vmem>>, vector<1x128xf32>
      %c0_11 = arith.constant 0 : index
      %c0_12 = arith.constant 0 : index
      %12 = vector.load %arg12[%c0_11, %c0_12] : memref<16x768xf32, #tpu.memory_space<vmem>>, vector<8x384xf32>
      %13 = vector.extract_strided_slice %12 {offsets = [0, 0], sizes = [8, 128], strides = [1, 1]} : vector<8x384xf32> to vector<8x128xf32>
      %14 = arith.negf %13 : vector<8x128xf32>
      %15 = math.exp %14 : vector<8x128xf32>
      %cst_13 = arith.constant 1.000000e+00 : f32
      %16 = vector.broadcast %cst_13 : f32 to vector<8x128xf32>
      %17 = arith.addf %16, %15 : vector<8x128xf32>
      %18 = arith.divf %16, %17 : vector<8x128xf32>
      %19 = vector.extract_strided_slice %12 {offsets = [0, 128], sizes = [8, 128], strides = [1, 1]} : vector<8x384xf32> to vector<8x128xf32>
      %20 = arith.negf %19 : vector<8x128xf32>
      %21 = math.exp %20 : vector<8x128xf32>
      %cst_14 = arith.constant 1.000000e+00 : f32
      %22 = vector.broadcast %cst_14 : f32 to vector<8x128xf32>
      %23 = arith.addf %22, %21 : vector<8x128xf32>
      %24 = arith.divf %22, %23 : vector<8x128xf32>
      %25 = vector.extract_strided_slice %12 {offsets = [0, 256], sizes = [8, 128], strides = [1, 1]} : vector<8x384xf32> to vector<8x128xf32>
      %26 = vector.broadcast %10 : vector<1x128xf32> to vector<8x128xf32>
      %27 = arith.mulf %18, %26 : vector<8x128xf32>
      %28 = arith.addf %25, %27 : vector<8x128xf32>
      %29 = math.tanh %28 : vector<8x128xf32>
      %30 = arith.mulf %24, %29 : vector<8x128xf32>
      %31 = arith.subf %29, %30 : vector<8x128xf32>
      %c8 = arith.constant 8 : index
      %c384 = arith.constant 384 : index
      %32 = vector.load %arg12[%c8, %c384] : memref<16x768xf32, #tpu.memory_space<vmem>>, vector<8x384xf32>
      %33 = vector.extract_strided_slice %32 {offsets = [0, 0], sizes = [8, 128], strides = [1, 1]} : vector<8x384xf32> to vector<8x128xf32>
      %34 = arith.negf %33 : vector<8x128xf32>
      %35 = math.exp %34 : vector<8x128xf32>
      %cst_15 = arith.constant 1.000000e+00 : f32
      %36 = vector.broadcast %cst_15 : f32 to vector<8x128xf32>
      %37 = arith.addf %36, %35 : vector<8x128xf32>
      %38 = arith.divf %36, %37 : vector<8x128xf32>
      %39 = vector.extract_strided_slice %32 {offsets = [0, 128], sizes = [8, 128], strides = [1, 1]} : vector<8x384xf32> to vector<8x128xf32>
      %40 = arith.negf %39 : vector<8x128xf32>
      %41 = math.exp %40 : vector<8x128xf32>
      %cst_16 = arith.constant 1.000000e+00 : f32
      %42 = vector.broadcast %cst_16 : f32 to vector<8x128xf32>
      %43 = arith.addf %42, %41 : vector<8x128xf32>
      %44 = arith.divf %42, %43 : vector<8x128xf32>
      %45 = vector.extract_strided_slice %32 {offsets = [0, 256], sizes = [8, 128], strides = [1, 1]} : vector<8x384xf32> to vector<8x128xf32>
      %46 = vector.broadcast %11 : vector<1x128xf32> to vector<8x128xf32>
      %47 = arith.mulf %38, %46 : vector<8x128xf32>
      %48 = arith.addf %45, %47 : vector<8x128xf32>
      %49 = math.tanh %48 : vector<8x128xf32>
      %50 = arith.mulf %44, %49 : vector<8x128xf32>
      %51 = arith.subf %49, %50 : vector<8x128xf32>
      %52 = arith.truncf %31 : vector<8x128xf32> to vector<8x128xbf16>
      %c0_17 = arith.constant 0 : index
      %c0_18 = arith.constant 0 : index
      %53 = vector.load %arg13[%c0_17, %c0_18] : memref<24x256xbf16, #tpu.memory_space<vmem>>, vector<8x128xbf16>
      tpu.vector_store %arg13[%c0_17, %c0_18], %52 {strides = array<i32>} : memref<24x256xbf16, #tpu.memory_space<vmem>>, vector<8x128xbf16>,
      %54 = arith.truncf %51 : vector<8x128xf32> to vector<8x128xbf16>
      %c8_19 = arith.constant 8 : index
      %c128 = arith.constant 128 : index
      %55 = vector.load %arg13[%c8_19, %c128] : memref<24x256xbf16, #tpu.memory_space<vmem>>, vector<8x128xbf16>
      tpu.vector_store %arg13[%c8_19, %c128], %54 {strides = array<i32>} : memref<24x256xbf16, #tpu.memory_space<vmem>>, vector<8x128xbf16>,
      %c1_i32 = arith.constant 1 : i32
      %c8_i32 = arith.constant 8 : i32
      %56 = arith.muli %c1_i32, %c8_i32 : i32
      %57 = tpu.assume_multiple %56, 8 : i32
      %c1_i32_20 = arith.constant 1 : i32
      %58 = arith.subi %c1_i32_20, %c1_i32 : i32
      %c8_i32_21 = arith.constant 8 : i32
      %59 = arith.muli %58, %c8_i32_21 : i32
      %60 = tpu.assume_multiple %59, 8 : i32
      %61 = arith.index_cast %57 : i32 to index
      %c0_22 = arith.constant 0 : index
      %62 = vector.load %arg12[%61, %c0_22] : memref<16x768xf32, #tpu.memory_space<vmem>>, vector<8x384xf32>
      %63 = arith.index_cast %60 : i32 to index
      %c384_23 = arith.constant 384 : index
      %64 = vector.load %arg12[%63, %c384_23] : memref<16x768xf32, #tpu.memory_space<vmem>>, vector<8x384xf32>
      %65 = tpu.concatenate %31, %51 in 1 : vector<8x128xf32>, vector<8x128xf32> -> vector<8x256xf32>
      %cst_24 = arith.constant dense<0.000000e+00> : vector<8x768xf32>
      %66 = tpu.matmul %65, %9, %cst_24 {dimension_numbers = #tpu.dot_dimension_numbers<[1], [0], [0], [1], [0, 0, 1, 1], [], []>} : vector<8x256xf32>, vector<256x768xf32>, vector<8x768xf32> -> vector<8x768xf32>
      %67 = vector.extract_strided_slice %66 {offsets = [0, 0], sizes = [8, 384], strides = [1, 1]} : vector<8x768xf32> to vector<8x384xf32>
      %68 = vector.extract_strided_slice %62 {offsets = [0, 0], sizes = [8, 128], strides = [1, 1]} : vector<8x384xf32> to vector<8x128xf32>
      %69 = vector.extract_strided_slice %67 {offsets = [0, 0], sizes = [8, 128], strides = [1, 1]} : vector<8x384xf32> to vector<8x128xf32>
      %70 = arith.addf %68, %69 : vector<8x128xf32>
      %71 = arith.negf %70 : vector<8x128xf32>
      %72 = math.exp %71 : vector<8x128xf32>
      %cst_25 = arith.constant 1.000000e+00 : f32
      %73 = vector.broadcast %cst_25 : f32 to vector<8x128xf32>
      %74 = arith.addf %73, %72 : vector<8x128xf32>
      %75 = arith.divf %73, %74 : vector<8x128xf32>
      %76 = vector.extract_strided_slice %62 {offsets = [0, 128], sizes = [8, 128], strides = [1, 1]} : vector<8x384xf32> to vector<8x128xf32>
      %77 = vector.extract_strided_slice %67 {offsets = [0, 128], sizes = [8, 128], strides = [1, 1]} : vector<8x384xf32> to vector<8x128xf32>
      %78 = arith.addf %76, %77 : vector<8x128xf32>
      %79 = arith.negf %78 : vector<8x128xf32>
      %80 = math.exp %79 : vector<8x128xf32>
      %cst_26 = arith.constant 1.000000e+00 : f32
      %81 = vector.broadcast %cst_26 : f32 to vector<8x128xf32>
      %82 = arith.addf %81, %80 : vector<8x128xf32>
      %83 = arith.divf %81, %82 : vector<8x128xf32>
      %84 = vector.extract_strided_slice %62 {offsets = [0, 256], sizes = [8, 128], strides = [1, 1]} : vector<8x384xf32> to vector<8x128xf32>
      %85 = vector.extract_strided_slice %67 {offsets = [0, 256], sizes = [8, 128], strides = [1, 1]} : vector<8x384xf32> to vector<8x128xf32>
      %86 = vector.broadcast %10 : vector<1x128xf32> to vector<8x128xf32>
      %87 = arith.addf %85, %86 : vector<8x128xf32>
      %88 = arith.mulf %75, %87 : vector<8x128xf32>
      %89 = arith.addf %84, %88 : vector<8x128xf32>
      %90 = math.tanh %89 : vector<8x128xf32>
      %91 = arith.subf %31, %90 : vector<8x128xf32>
      %92 = arith.mulf %83, %91 : vector<8x128xf32>
      %93 = arith.addf %90, %92 : vector<8x128xf32>
      %94 = vector.extract_strided_slice %66 {offsets = [0, 384], sizes = [8, 384], strides = [1, 1]} : vector<8x768xf32> to vector<8x384xf32>
      %95 = vector.extract_strided_slice %64 {offsets = [0, 0], sizes = [8, 128], strides = [1, 1]} : vector<8x384xf32> to vector<8x128xf32>
      %96 = vector.extract_strided_slice %94 {offsets = [0, 0], sizes = [8, 128], strides = [1, 1]} : vector<8x384xf32> to vector<8x128xf32>
      %97 = arith.addf %95, %96 : vector<8x128xf32>
      %98 = arith.negf %97 : vector<8x128xf32>
      %99 = math.exp %98 : vector<8x128xf32>
      %cst_27 = arith.constant 1.000000e+00 : f32
      %100 = vector.broadcast %cst_27 : f32 to vector<8x128xf32>
      %101 = arith.addf %100, %99 : vector<8x128xf32>
      %102 = arith.divf %100, %101 : vector<8x128xf32>
      %103 = vector.extract_strided_slice %64 {offsets = [0, 128], sizes = [8, 128], strides = [1, 1]} : vector<8x384xf32> to vector<8x128xf32>
      %104 = vector.extract_strided_slice %94 {offsets = [0, 128], sizes = [8, 128], strides = [1, 1]} : vector<8x384xf32> to vector<8x128xf32>
      %105 = arith.addf %103, %104 : vector<8x128xf32>
      %106 = arith.negf %105 : vector<8x128xf32>
      %107 = math.exp %106 : vector<8x128xf32>
      %cst_28 = arith.constant 1.000000e+00 : f32
      %108 = vector.broadcast %cst_28 : f32 to vector<8x128xf32>
      %109 = arith.addf %108, %107 : vector<8x128xf32>
      %110 = arith.divf %108, %109 : vector<8x128xf32>
      %111 = vector.extract_strided_slice %64 {offsets = [0, 256], sizes = [8, 128], strides = [1, 1]} : vector<8x384xf32> to vector<8x128xf32>
      %112 = vector.extract_strided_slice %94 {offsets = [0, 256], sizes = [8, 128], strides = [1, 1]} : vector<8x384xf32> to vector<8x128xf32>
      %113 = vector.broadcast %11 : vector<1x128xf32> to vector<8x128xf32>
      %114 = arith.addf %112, %113 : vector<8x128xf32>
      %115 = arith.mulf %102, %114 : vector<8x128xf32>
      %116 = arith.addf %111, %115 : vector<8x128xf32>
      %117 = math.tanh %116 : vector<8x128xf32>
      %118 = arith.subf %51, %117 : vector<8x128xf32>
      %119 = arith.mulf %110, %118 : vector<8x128xf32>
      %120 = arith.addf %117, %119 : vector<8x128xf32>
      %121 = arith.truncf %93 : vector<8x128xf32> to vector<8x128xbf16>
      %122 = arith.index_cast %57 : i32 to index
      %c0_29 = arith.constant 0 : index
      %123 = vector.load %arg13[%122, %c0_29] : memref<24x256xbf16, #tpu.memory_space<vmem>>, vector<8x128xbf16>
      tpu.vector_store %arg13[%122, %c0_29], %121 {strides = array<i32>} : memref<24x256xbf16, #tpu.memory_space<vmem>>, vector<8x128xbf16>,
      %124 = arith.truncf %120 : vector<8x128xf32> to vector<8x128xbf16>
      %125 = arith.index_cast %60 : i32 to index
      %c128_30 = arith.constant 128 : index
      %126 = vector.load %arg13[%125, %c128_30] : memref<24x256xbf16, #tpu.memory_space<vmem>>, vector<8x128xbf16>
      tpu.vector_store %arg13[%125, %c128_30], %124 {strides = array<i32>} : memref<24x256xbf16, #tpu.memory_space<vmem>>, vector<8x128xbf16>,
      %c1_i32_31 = arith.constant 1 : i32
      %cst_32 = arith.constant 0.000000e+00 : bf16
      %127 = vector.broadcast %cst_32 : bf16 to vector<8x256xbf16>
      %c16 = arith.constant 16 : index
      %c0_33 = arith.constant 0 : index
      %128 = vector.load %arg13[%c16, %c0_33] : memref<24x256xbf16, #tpu.memory_space<vmem>>, vector<8x256xbf16>
      tpu.vector_store %arg13[%c16, %c0_33], %127 {strides = array<i32>} : memref<24x256xbf16, #tpu.memory_space<vmem>>, vector<8x256xbf16>,
      %c0_34 = arith.constant 0 : index
      %c0_35 = arith.constant 0 : index
      %129 = vector.load %arg13[%c0_34, %c0_35] : memref<24x256xbf16, #tpu.memory_space<vmem>>, vector<16x256xbf16>
      %c0_36 = arith.constant 0 : index
      %c0_37 = arith.constant 0 : index
      %130 = vector.load %arg6[%c0_36, %c0_37] : memref<256x128xbf16, #tpu.memory_space<vmem>>, vector<256x128xbf16>
      %cst_38 = arith.constant dense<0.000000e+00> : vector<16x128xf32>
      %131 = tpu.matmul %129, %130, %cst_38 {dimension_numbers = #tpu.dot_dimension_numbers<[1], [0], [0], [1], [0, 0, 1, 1], [], []>} : vector<16x256xbf16>, vector<256x128xbf16>, vector<16x128xf32> -> vector<16x128xf32>
      %c1 = arith.constant 1 : index
      %c0_39 = arith.constant 0 : index
      %132 = vector.load %arg13[%c1, %c0_39] : memref<24x256xbf16, #tpu.memory_space<vmem>>, vector<16x256xbf16>
      %c0_40 = arith.constant 0 : index
      %c0_41 = arith.constant 0 : index
      %133 = vector.load %arg7[%c0_40, %c0_41] : memref<256x128xbf16, #tpu.memory_space<vmem>>, vector<256x128xbf16>
      %cst_42 = arith.constant dense<0.000000e+00> : vector<16x128xf32>
      %134 = tpu.matmul %132, %133, %cst_42 {dimension_numbers = #tpu.dot_dimension_numbers<[1], [0], [0], [1], [0, 0, 1, 1], [], []>} : vector<16x256xbf16>, vector<256x128xbf16>, vector<16x128xf32> -> vector<16x128xf32>
      %135 = arith.addf %131, %134 : vector<16x128xf32>
      %c0_43 = arith.constant 0 : index
      %c0_44 = arith.constant 0 : index
      %136 = vector.load %arg8[%c0_43, %c0_44] : memref<1x128xf32, #tpu.memory_space<vmem>>, vector<1x128xf32>
      %137 = vector.broadcast %136 : vector<1x128xf32> to vector<16x128xf32>
      %138 = arith.addf %135, %137 : vector<16x128xf32>
      %cst_45 = arith.constant 0.000000e+00 : f32
      %139 = vector.broadcast %cst_45 : f32 to vector<16x128xf32>
      %140 = arith.maximumf %138, %139 : vector<16x128xf32>
      %141 = vector.shape_cast %140 : vector<16x128xf32> to vector<2x8x128xf32>
      %142 = tpu.iota {dimensions = array<i32: 1>} : vector<2x8x128xi32>
      %c7_i32 = arith.constant 7 : i32
      %143 = vector.broadcast %c7_i32 : i32 to vector<2x8x128xi32>
      %144 = arith.cmpi ne, %142, %143 : vector<2x8x128xi32>
      %cst_46 = arith.constant 0.000000e+00 : f32
      %145 = vector.broadcast %cst_46 : f32 to vector<2x8x128xf32>
      %146 = arith.select %144, %141, %145 : vector<2x8x128xi1>, vector<2x8x128xf32>
      %cst_47 = arith.constant dense<0xFF800000> : vector<2x128xf32>
      %147 = vector.multi_reduction <maximumf>, %146, %cst_47 [1] : vector<2x8x128xf32> to vector<2x128xf32>
      %c0_48 = arith.constant 0 : index
      %c0_49 = arith.constant 0 : index
      %148 = vector.load %arg9[%c0_48, %c0_49] : memref<128x1xf32, #tpu.memory_space<vmem>>, vector<128x1xf32>
      %cst_50 = arith.constant dense<0.000000e+00> : vector<2x1xf32>
      %149 = tpu.matmul %147, %148, %cst_50 {dimension_numbers = #tpu.dot_dimension_numbers<[1], [0], [0], [1], [0, 0, 1, 1], [], []>} : vector<2x128xf32>, vector<128x1xf32>, vector<2x1xf32> -> vector<2x1xf32>
      %c0_51 = arith.constant 0 : index
      %c0_52 = arith.constant 0 : index
      %150 = vector.load %arg10[%c0_51, %c0_52] : memref<1x1xf32, #tpu.memory_space<vmem>>, vector<1x1xf32>
      %151 = vector.broadcast %150 : vector<1x1xf32> to vector<2x1xf32>
      %152 = arith.addf %149, %151 : vector<2x1xf32>
      %c0_53 = arith.constant 0 : index
      %c0_54 = arith.constant 0 : index
      %153 = vector.load %arg11[%c0_53, %c0_54] : memref<2x1xf32, #tpu.memory_space<vmem>>, vector<2x1xf32>
      tpu.vector_store %arg11[%c0_53, %c0_54], %152 {strides = array<i32>} : memref<2x1xf32, #tpu.memory_space<vmem>>, vector<2x1xf32>,
    } else {
    }
    return
  }
  func.func @transform_0(%arg0: i32) -> (i32, i32) {
    %c0_i32 = arith.constant 0 : i32
    %c0_i32_0 = arith.constant 0 : i32
    return %arg0, %c0_i32 : i32, i32
  }
  func.func @transform_1(%arg0: i32) -> (i32, i32) {
    %c0_i32 = arith.constant 0 : i32
    %c0_i32_0 = arith.constant 0 : i32
    %c0_i32_1 = arith.constant 0 : i32
    return %c0_i32, %c0_i32_0 : i32, i32
  }
  func.func @transform_2(%arg0: i32) -> (i32, i32) {
    %c0_i32 = arith.constant 0 : i32
    %c0_i32_0 = arith.constant 0 : i32
    %c0_i32_1 = arith.constant 0 : i32
    return %c0_i32, %c0_i32_0 : i32, i32
  }
  func.func @transform_3(%arg0: i32) -> (i32, i32) {
    %c0_i32 = arith.constant 0 : i32
    %c0_i32_0 = arith.constant 0 : i32
    %c0_i32_1 = arith.constant 0 : i32
    return %c0_i32, %c0_i32_0 : i32, i32
  }
  func.func @transform_4(%arg0: i32) -> (i32, i32) {
    %c0_i32 = arith.constant 0 : i32
    %c0_i32_0 = arith.constant 0 : i32
    %c0_i32_1 = arith.constant 0 : i32
    return %c0_i32, %c0_i32_0 : i32, i32
  }
  func.func @transform_5(%arg0: i32) -> (i32, i32) {
    %c0_i32 = arith.constant 0 : i32
    %c0_i32_0 = arith.constant 0 : i32
    %c0_i32_1 = arith.constant 0 : i32
    return %c0_i32, %c0_i32_0 : i32, i32
  }
  func.func @transform_6(%arg0: i32) -> (i32, i32) {
    %c0_i32 = arith.constant 0 : i32
    %c0_i32_0 = arith.constant 0 : i32
    %c0_i32_1 = arith.constant 0 : i32
    return %c0_i32, %c0_i32_0 : i32, i32
  }
  func.func @transform_7(%arg0: i32) -> (i32, i32) {
    %c0_i32 = arith.constant 0 : i32
    %c0_i32_0 = arith.constant 0 : i32
    %c0_i32_1 = arith.constant 0 : i32
    return %c0_i32, %c0_i32_0 : i32, i32
  }
  func.func @transform_8(%arg0: i32) -> (i32, i32) {
    %c0_i32 = arith.constant 0 : i32
    %c0_i32_0 = arith.constant 0 : i32
    %c0_i32_1 = arith.constant 0 : i32
    return %c0_i32, %c0_i32_0 : i32, i32
  }
  func.func @transform_9(%arg0: i32) -> (i32, i32) {
    %c0_i32 = arith.constant 0 : i32
    %c0_i32_0 = arith.constant 0 : i32
    %c0_i32_1 = arith.constant 0 : i32
    return %c0_i32, %c0_i32_0 : i32, i32
  }
  func.func @transform_10(%arg0: i32) -> (i32, i32) {
    %c0_i32 = arith.constant 0 : i32
    %c0_i32_0 = arith.constant 0 : i32
    %c0_i32_1 = arith.constant 0 : i32
    return %c0_i32, %c0_i32_0 : i32, i32
  }
}

</mosaic_0001>

<bundles_post_ra>
// kernel: gru_cnn_forward.1
= control target key start
LH: loop header
LB: loop body
LE: loop exit
PB: predicated region body
PF: predicated region fallthrough
CT: control target
= control target key end

     0   :  { %s3231_s0 = inlined_call_operand.vmem [shape: bf16[16,384], index: 0, kind: input, shape index: {}]   ;;  %s3232_s1 = inlined_call_operand.hbm [shape: bf16[384,768], index: 1, kind: input, shape index: {}]   ;;  %s3233_s2 = inlined_call_operand.hbm [shape: f32[256,768], index: 2, kind: input, shape index: {}]   ;;  %s3234_s3 = inlined_call_operand.vmem [shape: f32[1,128], index: 3, kind: input, shape index: {}]   ;;  %s3235_s4 = inlined_call_operand.vmem [shape: f32[1,128], index: 4, kind: input, shape index: {}]   ;;  %s3236_s5 = inlined_call_operand.vmem [shape: bf16[256,128], index: 5, kind: input, shape index: {}]   ;;  %s3237_s6 = inlined_call_operand.vmem [shape: bf16[256,128], index: 6, kind: input, shape index: {}]   ;;  %s3238_s7 = inlined_call_operand.vmem [shape: f32[1,128], index: 7, kind: input, shape index: {}]   ;;  %s3239_s8 = inlined_call_operand.vmem [shape: f32[128,1], index: 8, kind: input, shape index: {}]   ;;  %s3240_s9 = inlined_call_operand.<no memory space> [shape: f32[1,1], index: 9, kind: input, shape index: {}]   ;;  %s3241_s10 = inlined_call_operand.vmem [shape: f32[2,1], index: 10, kind: output, shape index: {}]  }
   0x1   :  { %v15_v0 = vstv %s3240_s9 }
   0x2   :  { %16 = vst [vmem:[#allocation4] sm:$0x1] %v15_v0 }
   0x3   :  { %17 = vsyncpa [#allocation6], 0 }
   0x4   :  { %18 = vsyncpa [#allocation8], 0  ;;  %s2932_s15 = smov [#allocation5]  }
   0x5   :  { %s26_s16 = sshll.u32 %s2932_s15, 4  ;;  %s27_s16 = int_to_ptr.vmem [resolvable:$true] %s26_s16 }
   0x6   :  { %s2896_s17 = scalar_lea.vmem %s27_s16, 18432  ;;  %p2901_p1 = scmp.lt.s32.totalorder %s27_s16, %s27_s16 }
   0x7   :  { %p2897_p0 = scmp.ne.s32.totalorder %s27_s16, %s2896_s17  ;;  %p2902_p2 = scmp.lt.s32.totalorder %s2896_s17, %s2896_s17 }
   0x9   :  { %p2903_p3 = por %p2902_p2, %p2901_p1 }
   0xb   :  { %p2904_p4 = pnand %p2903_p3, %p2897_p0 }
   0xd   :  { %2907 = shalt.err (!%p2904_p4)
}
   0xe   :  { %s2933_s18 = smov 384   ;;  %s2934_s19 = smov 24  }
   0xf   :  { %32 = dma.hbm_to_vmem [thread:$0]  %s3232_s1, 18432, %s27_s16, [#allocation6], %s2933_s18, %s2933_s18, %s2934_s19  }
  0x10   :  { %s2935_s9 = smov [#allocation7]  }
  0x11   :  { %s38_s22 = sshll.u32 %s2935_s9, 4  ;;  %s39_s22 = int_to_ptr.vmem [resolvable:$true] %s38_s22 }
  0x12   :  { %s2916_s23 = scalar_lea.vmem %s39_s22, 24576  ;;  %p2921_p6 = scmp.lt.s32.totalorder %s39_s22, %s39_s22 }
  0x13   :  { %p2917_p5 = scmp.ne.s32.totalorder %s39_s22, %s2916_s23  ;;  %p2922_p7 = scmp.lt.s32.totalorder %s2916_s23, %s2916_s23 }
  0x15   :  { %p2923_p8 = por %p2922_p7, %p2921_p6 }
  0x17   :  { %p2924_p9 = pnand %p2923_p8, %p2917_p5 }
  0x19   :  { %2927 = shalt.err (!%p2924_p9)
}
  0x1a   :  { %s2936_s24 = smov 768   ;;  %s2937_s25 = smov 48  }
  0x1b   :  { %44 = dma.hbm_to_vmem [thread:$0]  %s3233_s2, 24576, %s39_s22, [#allocation8], %s2936_s24, %s2936_s24, %s2937_s25  }
  0x1c   :  { %2928 = dma.done.wait [#allocation6], 18432  }
  0x1d   :  { %2929 = vsyncadd [#allocation6], 4294948864 }
  0x1e   :  { %2930 = dma.done.wait [#allocation8], 24576  }
  0x1f   :  { %2931 = vsyncadd [#allocation8], 4294942720  ;;  %v2938_v1 = vmov 0   ;;  %v2591_v2 = vld [vmem:[#allocation5 + $0x154] ss:$24 sps:$4 sm:$0xff]   ;;  %vm2940_vm1 = vmmov 0  }
  0x20   :  { %1025 = vmatprep.mubr.bf16.mxu1 %v2938_v1  ;;  %1757 = vst [vmem:[#allocation3 + $0x10] sm:$0xff] %v2938_v1  ;;  %v2593_v3 = vld [vmem:[#allocation5 + $0x454] ss:$24 sps:$4 sm:$0xff]   ;;  %950 = vmatprep.subr.bf16.mxu0 %v2591_v2  ;;  %v2595_v4 = vld [vmem:[#allocation5 + $0x150] ss:$24 sps:$4 sm:$0xff]   ;;  %vm2204_vm3 = vcmask 1041409  }
  0x21   :  { %v2596_v5 = vld [vmem:[#allocation5 + $0x450] ss:$24 sps:$4 sm:$0xff]   ;;  %993 = vmatprep.subr.bf16.mxu1 %v2593_v3  ;;  %v2597_v6 = vld [vmem:[#allocation5 + $0x124] ss:$24 sps:$4 sm:$0xff]   ;;  %951 = vmatpush1.bf16.msra.mxu0 %v2595_v4  ;;  %v2601_v8 = vld [vmem:[#allocation5 + $0x120] ss:$24 sps:$4 sm:$0xff]  }
  0x22   :  { %994 = vmatpush1.bf16.msra.mxu1 %v2596_v5  ;;  %v2599_v7 = vld [vmem:[#allocation5 + $0x424] ss:$24 sps:$4 sm:$0xff]   ;;  %952 = vmatprep.subr.bf16.mxu0 %v2597_v6  ;;  %v2602_v9 = vld [vmem:[#allocation5 + $0x420] ss:$24 sps:$4 sm:$0xff]   ;;  %v2603_v10 = vld [vmem:[#allocation5 + $0xf4] ss:$24 sps:$4 sm:$0xff]  }
  0x23   :  { %995 = vmatprep.subr.bf16.mxu1 %v2599_v7  ;;  %v2605_v11 = vld [vmem:[#allocation5 + $0x3f4] ss:$24 sps:$4 sm:$0xff]   ;;  %v2607_v12 = vld [vmem:[#allocation5 + $0xf0] ss:$24 sps:$4 sm:$0xff]   ;;  %v2609_v14 = vld [vmem:[#allocation5 + $0xc4] ss:$24 sps:$4 sm:$0xff]  }
  0x24   :  { %v2608_v13 = vld [vmem:[#allocation5 + $0x3f0] ss:$24 sps:$4 sm:$0xff]   ;;  %v2611_v15 = vld [vmem:[#allocation5 + $0x3c4] ss:$24 sps:$4 sm:$0xff]   ;;  %v2613_v16 = vld [vmem:[#allocation5 + $0xc0] ss:$24 sps:$4 sm:$0xff]  }
  0x25   :  { %953 = vmatpush1.bf16.msra.mxu0 %v2601_v8  ;;  %v2614_v17 = vld [vmem:[#allocation5 + $0x3c0] ss:$24 sps:$4 sm:$0xff]   ;;  %v2615_v18 = vld [vmem:[#allocation5 + $0x94] ss:$24 sps:$4 sm:$0xff]   ;;  %v2619_v20 = vld [vmem:[#allocation5 + $0x90] ss:$24 sps:$4 sm:$0xff]  }
  0x26   :  { %996 = vmatpush1.bf16.msra.mxu1 %v2602_v9  ;;  %954 = vmatprep.subr.bf16.mxu0 %v2603_v10  ;;  %v2617_v19 = vld [vmem:[#allocation5 + $0x394] ss:$24 sps:$4 sm:$0xff]   ;;  %v2620_v21 = vld [vmem:[#allocation5 + $0x390] ss:$24 sps:$4 sm:$0xff]   ;;  %v2621_v22 = vld [vmem:[#allocation5 + $0x64] ss:$24 sps:$4 sm:$0xff]  }
  0x27   :  { %997 = vmatprep.subr.bf16.mxu1 %v2605_v11  ;;  %v2623_v23 = vld [vmem:[#allocation5 + $0x364] ss:$24 sps:$4 sm:$0xff]   ;;  %v2625_v24 = vld [vmem:[#allocation5 + $0x60] ss:$24 sps:$4 sm:$0xff]   ;;  %v2627_v26 = vld [vmem:[#allocation5 + $0x34] ss:$24 sps:$4 sm:$0xff]  }
  0x28   :  { %v2626_v25 = vld [vmem:[#allocation5 + $0x360] ss:$24 sps:$4 sm:$0xff]   ;;  %v2629_v27 = vld [vmem:[#allocation5 + $0x334] ss:$24 sps:$4 sm:$0xff]   ;;  %v2631_v28 = vld [vmem:[#allocation5 + $0x30] ss:$24 sps:$4 sm:$0xff]  }
  0x29   :  { %955 = vmatpush1.bf16.msra.mxu0 %v2607_v12  ;;  %v2632_v29 = vld [vmem:[#allocation5 + $0x330] ss:$24 sps:$4 sm:$0xff]   ;;  %v2633_v30 = vld [vmem:[#allocation5 + $0x4] ss:$24 sps:$4 sm:$0xff]   ;;  %v2637_v32 = vld [vmem:[#allocation5] ss:$24 sps:$4 sm:$0xff]  }
  0x2a   :  { %998 = vmatpush1.bf16.msra.mxu1 %v2608_v13  ;;  %956 = vmatprep.subr.bf16.mxu0 %v2609_v14  ;;  %v2635_v31 = vld [vmem:[#allocation5 + $0x304] ss:$24 sps:$4 sm:$0xff]   ;;  %v2638_v33 = vld [vmem:[#allocation5 + $0x300] ss:$24 sps:$4 sm:$0xff]   ;;  %v2639_v34 = vld [vmem:[#allocation5 + $0x2d4] ss:$24 sps:$4 sm:$0xff]  }
  0x2b   :  { %999 = vmatprep.subr.bf16.mxu1 %v2611_v15  ;;  %v2643_v35 = vld [vmem:[#allocation5 + $0x15c] ss:$24 sps:$4 sm:$0xff]   ;;  %v2641_v37 = vld [vmem:[#allocation5 + $0x158] ss:$24 sps:$4 sm:$0xff]   ;;  %v2650_v40 = vld [vmem:[#allocation5 + $0x12c] ss:$24 sps:$4 sm:$0xff]  }
  0x2c   :  { %v3010_v36 = vld [vmem:[%s3231_s0 + $0x8] ss:$12 sps:$4 sm:$0xff]   ;;  %v2648_v41 = vld [vmem:[#allocation5 + $0x128] ss:$24 sps:$4 sm:$0xff]   ;;  %vm1840_vm0 = vsmask.f32 7424 }
  0x2d   :  { %957 = vmatpush1.bf16.msra.mxu0 %v2613_v16  ;;  %v2644_v38 = vld [vmem:[#allocation5 + $0x2d0] ss:$24 sps:$4 sm:$0xff]   ;;  %v2646_v39 = vld [vmem:[#allocation5 + $0x2a4] ss:$24 sps:$4 sm:$0xff]   ;;  %v2651_v42 = vld [vmem:[#allocation5 + $0x2a0] ss:$24 sps:$4 sm:$0xff]  }
  0x2e   :  { %1000 = vmatpush1.bf16.msra.mxu1 %v2614_v17  ;;  %958 = vmatprep.subr.bf16.mxu0 %v2615_v18  ;;  %v2652_v43 = vld [vmem:[#allocation5 + $0x274] ss:$24 sps:$4 sm:$0xff]   ;;  %v2654_v45 = vld [vmem:[#allocation5 + $0xf8] ss:$24 sps:$4 sm:$0xff]   ;;  %v2658_v47 = vld [vmem:[#allocation5 + $0x244] ss:$24 sps:$4 sm:$0xff]  }
  0x2f   :  { %1001 = vmatprep.subr.bf16.mxu1 %v2617_v19  ;;  %v2656_v44 = vld [vmem:[#allocation5 + $0xfc] ss:$24 sps:$4 sm:$0xff]   ;;  %v2657_v46 = vld [vmem:[#allocation5 + $0x270] ss:$24 sps:$4 sm:$0xff]   ;;  %v2662_v48 = vld [vmem:[#allocation5 + $0xcc] ss:$24 sps:$4 sm:$0xff]  }
  0x30   :  { %v2660_v49 = vld [vmem:[#allocation5 + $0xc8] ss:$24 sps:$4 sm:$0xff]   ;;  %v2664_v51 = vld [vmem:[#allocation5 + $0x214] ss:$24 sps:$4 sm:$0xff]   ;;  %v2666_v54 = vld [vmem:[#allocation5 + $0x98] ss:$24 sps:$4 sm:$0xff]  }
  0x31   :  { %959 = vmatpush1.bf16.msra.mxu0 %v2619_v20  ;;  %v2663_v50 = vld [vmem:[#allocation5 + $0x240] ss:$24 sps:$4 sm:$0xff]   ;;  %v2668_v53 = vld [vmem:[#allocation5 + $0x9c] ss:$24 sps:$4 sm:$0xff]   ;;  %v2669_v55 = vld [vmem:[#allocation5 + $0x210] ss:$24 sps:$4 sm:$0xff]  }
  0x32   :  { %1002 = vmatpush1.bf16.msra.mxu1 %v2620_v21  ;;  %960 = vmatprep.subr.bf16.mxu0 %v2621_v22  ;;  %v3016_v52 = vld [vmem:[%s3231_s0 + $0x4] ss:$12 sps:$4 sm:$0xff]   ;;  %v2670_v56 = vld [vmem:[#allocation5 + $0x1e4] ss:$24 sps:$4 sm:$0xff]   ;;  %vm2277_vm4 = vcmask 1024  }
  0x33   :  { %1003 = vmatprep.subr.bf16.mxu1 %v2623_v23  ;;  %982 = vmatprep.mubr.bf16.mxu0 %v3016_v52  ;;  %v2674_v57 = vld [vmem:[#allocation5 + $0x6c] ss:$24 sps:$4 sm:$0xff]   ;;  %v2672_v58 = vld [vmem:[#allocation5 + $0x68] ss:$24 sps:$4 sm:$0xff]   ;;  %v2680_v61 = vld [vmem:[#allocation5 + $0x3c] ss:$24 sps:$4 sm:$0xff]  }
  0x34   :  { %v2675_v59 = vld [vmem:[#allocation5 + $0x1e0] ss:$24 sps:$4 sm:$0xff]   ;;  %v2676_v60 = vld [vmem:[#allocation5 + $0x1b4] ss:$24 sps:$4 sm:$0xff]   ;;  %v2681_v63 = vld [vmem:[#allocation5 + $0x1b0] ss:$24 sps:$4 sm:$0xff]  }
  0x35   :  { %961 = vmatpush1.bf16.msra.mxu0 %v2625_v24  ;;  %v2678_v62 = vld [vmem:[#allocation5 + $0x38] ss:$24 sps:$4 sm:$0xff]   ;;  %v2682_v0 = vld [vmem:[#allocation5 + $0x184] ss:$24 sps:$4 sm:$0xff]   ;;  %v2684_v3 = vld [vmem:[#allocation5 + $0x8] ss:$24 sps:$4 sm:$0xff]  }
  0x36   :  { %1004 = vmatpush1.bf16.msra.mxu1 %v2626_v25  ;;  %962 = vmatprep.subr.bf16.mxu0 %v2627_v26  ;;  %v2686_v2 = vld [vmem:[#allocation5 + $0xc] ss:$24 sps:$4 sm:$0xff]   ;;  %v2687_v4 = vld [vmem:[#allocation5 + $0x180] ss:$24 sps:$4 sm:$0xff]   ;;  %v2693_v5 = vld [vmem:[#allocation5 + $0x2dc] ss:$24 sps:$4 sm:$0xff]  }
  0x37   :  { %1005 = vmatprep.subr.bf16.mxu1 %v2629_v27  ;;  %v2696_v6 = vld [vmem:[#allocation5 + $0x45c] ss:$24 sps:$4 sm:$0xff]   ;;  %v2691_v8 = vld [vmem:[#allocation5 + $0x2d8] ss:$24 sps:$4 sm:$0xff]   ;;  %v2699_v10 = vld [vmem:[#allocation5 + $0x2ac] ss:$24 sps:$4 sm:$0xff]  }
  0x38   :  { %v3023_v7 = vld [vmem:[%s3231_s0] ss:$12 sps:$4 sm:$0xff]  }
  0x39   :  { %963 = vmatpush1.bf16.msra.mxu0 %v2631_v28  ;;  %v2694_v9 = vld [vmem:[#allocation5 + $0x458] ss:$24 sps:$4 sm:$0xff]   ;;  %v2702_v11 = vld [vmem:[#allocation5 + $0x42c] ss:$24 sps:$4 sm:$0xff]   ;;  %v2697_v12 = vld [vmem:[#allocation5 + $0x2a8] ss:$24 sps:$4 sm:$0xff]  }
  0x3a   :  { %1006 = vmatpush1.bf16.msra.mxu1 %v2632_v29  ;;  %964 = vmatprep.subr.bf16.mxu0 %v2633_v30  ;;  %v2700_v13 = vld [vmem:[#allocation5 + $0x428] ss:$24 sps:$4 sm:$0xff]   ;;  %v2705_v14 = vld [vmem:[#allocation5 + $0x27c] ss:$24 sps:$4 sm:$0xff]   ;;  %v2703_v16 = vld [vmem:[#allocation5 + $0x278] ss:$24 sps:$4 sm:$0xff]  }
  0x3b   :  { %1007 = vmatprep.subr.bf16.mxu1 %v2635_v31  ;;  %v2708_v15 = vld [vmem:[#allocation5 + $0x3fc] ss:$24 sps:$4 sm:$0xff]   ;;  %v2706_v17 = vld [vmem:[#allocation5 + $0x3f8] ss:$24 sps:$4 sm:$0xff]   ;;  %v2711_v18 = vld [vmem:[#allocation5 + $0x24c] ss:$24 sps:$4 sm:$0xff]  }
  0x3c   :  { %v2714_v19 = vld [vmem:[#allocation5 + $0x3cc] ss:$24 sps:$4 sm:$0xff]   ;;  %v2709_v20 = vld [vmem:[#allocation5 + $0x248] ss:$24 sps:$4 sm:$0xff]   ;;  %v2717_v22 = vld [vmem:[#allocation5 + $0x21c] ss:$24 sps:$4 sm:$0xff]  }
  0x3d   :  { %965 = vmatpush1.bf16.msra.mxu0 %v2637_v32  ;;  %v2712_v21 = vld [vmem:[#allocation5 + $0x3c8] ss:$24 sps:$4 sm:$0xff]   ;;  %v2720_v23 = vld [vmem:[#allocation5 + $0x39c] ss:$24 sps:$4 sm:$0xff]   ;;  %v2715_v24 = vld [vmem:[#allocation5 + $0x218] ss:$24 sps:$4 sm:$0xff]  }
  0x3e   :  { %1008 = vmatpush1.bf16.msra.mxu1 %v2638_v33  ;;  %966 = vmatprep.subr.bf16.mxu0 %v2639_v34  ;;  %v2718_v25 = vld [vmem:[#allocation5 + $0x398] ss:$24 sps:$4 sm:$0xff]   ;;  %v2723_v26 = vld [vmem:[#allocation5 + $0x1ec] ss:$24 sps:$4 sm:$0xff]   ;;  %v2721_v28 = vld [vmem:[#allocation5 + $0x1e8] ss:$24 sps:$4 sm:$0xff]  }
  0x3f   :  { %1036 = vmatprep.subr.bf16.mxu1 %v2643_v35  ;;  %v2726_v27 = vld [vmem:[#allocation5 + $0x36c] ss:$24 sps:$4 sm:$0xff]   ;;  %v2724_v29 = vld [vmem:[#allocation5 + $0x368] ss:$24 sps:$4 sm:$0xff]   ;;  %v2729_v30 = vld [vmem:[#allocation5 + $0x1bc] ss:$24 sps:$4 sm:$0xff]  }
  0x40   :  { %v2732_v31 = vld [vmem:[#allocation5 + $0x33c] ss:$24 sps:$4 sm:$0xff]   ;;  %v2727_v32 = vld [vmem:[#allocation5 + $0x1b8] ss:$24 sps:$4 sm:$0xff]   ;;  %v2735_v34 = vld [vmem:[#allocation5 + $0x18c] ss:$24 sps:$4 sm:$0xff]  }
  0x41   :  { %1026 = vmatmul.mubr.bf16.vlgmr.msra.gmra.mxu1 %v3010_v36  ;;  %967 = vmatpush2.bf16.msra.mxu0 %v2644_v38  ;;  %v2730_v33 = vld [vmem:[#allocation5 + $0x338] ss:$24 sps:$4 sm:$0xff]   ;;  %v2738_v35 = vld [vmem:[#allocation5 + $0x30c] ss:$24 sps:$4 sm:$0xff]   ;;  %v2736_v38 = vld [vmem:[#allocation5 + $0x308] ss:$24 sps:$4 sm:$0xff]  }
  0x42   :  { %1037 = vmatpush1.bf16.msra.mxu1 %v2641_v37  ;;  %968 = vmatprep.subr.bf16.mxu0 %v2646_v39  ;;  %v2733_v37 = vld [vmem:[#allocation5 + $0x188] ss:$24 sps:$4 sm:$0xff]   ;;  %v2741_v39 = vld [vmem:[#allocation5 + $0x164] ss:$24 sps:$4 sm:$0xff]  }
  0x43   :  { %1038 = vmatprep.subr.bf16.mxu1 %v2650_v40  ;;  %1068 = vmatprep.mubr.bf16.mxu1 %v3016_v52  ;;  %v2762_v40 = vld [vmem:[#allocation5 + $0x464] ss:$24 sps:$4 sm:$0xff]  }
  0x45   :  { %969 = vmatpush2.bf16.msra.mxu0 %v2651_v42  ;;  %v2744_v42 = vld [vmem:[#allocation5 + $0x134] ss:$24 sps:$4 sm:$0xff]  }
  0x46   :  { %1039 = vmatpush1.bf16.msra.mxu1 %v2648_v41  ;;  %970 = vmatprep.subr.bf16.mxu0 %v2652_v43  ;;  %v2739_v41 = vld [vmem:[#allocation5 + $0x160] ss:$24 sps:$4 sm:$0xff]  }
  0x47   :  { %1040 = vmatprep.subr.bf16.mxu1 %v2656_v44  ;;  %v2760_v43 = vld [vmem:[#allocation5 + $0x460] ss:$24 sps:$4 sm:$0xff]   ;;  %v2768_v44 = vld [vmem:[#allocation5 + $0x434] ss:$24 sps:$4 sm:$0xff]  }
  0x49   :  { %971 = vmatpush2.bf16.msra.mxu0 %v2657_v46  ;;  %v2766_v46 = vld [vmem:[#allocation5 + $0x430] ss:$24 sps:$4 sm:$0xff]  }
  0x4a   :  { %1041 = vmatpush1.bf16.msra.mxu1 %v2654_v45  ;;  %972 = vmatprep.subr.bf16.mxu0 %v2658_v47  ;;  %v2742_v45 = vld [vmem:[#allocation5 + $0x130] ss:$24 sps:$4 sm:$0xff]   ;;  %v2747_v47 = vld [vmem:[#allocation5 + $0x104] ss:$24 sps:$4 sm:$0xff]  }
  0x4b   :  { %1042 = vmatprep.subr.bf16.mxu1 %v2662_v48  ;;  %v2774_v48 = vld [vmem:[#allocation5 + $0x404] ss:$24 sps:$4 sm:$0xff]  }
  0x4d   :  { %973 = vmatpush2.bf16.msra.mxu0 %v2663_v50  ;;  %v2772_v50 = vld [vmem:[#allocation5 + $0x400] ss:$24 sps:$4 sm:$0xff]  }
  0x4e   :  { %1043 = vmatpush1.bf16.msra.mxu1 %v2660_v49  ;;  %974 = vmatprep.subr.bf16.mxu0 %v2664_v51  ;;  %v2745_v49 = vld [vmem:[#allocation5 + $0x100] ss:$24 sps:$4 sm:$0xff]   ;;  %v2750_v51 = vld [vmem:[#allocation5 + $0xd4] ss:$24 sps:$4 sm:$0xff]  }
  0x4f   :  { %1044 = vmatprep.subr.bf16.mxu1 %v2668_v53  ;;  %v2780_v53 = vld [vmem:[#allocation5 + $0x3d4] ss:$24 sps:$4 sm:$0xff]  }
  0x51   :  { %975 = vmatpush2.bf16.msra.mxu0 %v2669_v55  ;;  %v2778_v55 = vld [vmem:[#allocation5 + $0x3d0] ss:$24 sps:$4 sm:$0xff]  }
  0x52   :  { %1045 = vmatpush1.bf16.msra.mxu1 %v2666_v54  ;;  %976 = vmatprep.subr.bf16.mxu0 %v2670_v56  ;;  %v2748_v54 = vld [vmem:[#allocation5 + $0xd0] ss:$24 sps:$4 sm:$0xff]   ;;  %v2753_v56 = vld [vmem:[#allocation5 + $0xa4] ss:$24 sps:$4 sm:$0xff]  }
  0x53   :  { %1046 = vmatprep.subr.bf16.mxu1 %v2674_v57  ;;  %v2786_v57 = vld [vmem:[#allocation5 + $0x3a4] ss:$24 sps:$4 sm:$0xff]  }
  0x55   :  { %977 = vmatpush2.bf16.msra.mxu0 %v2675_v59  ;;  %v2784_v59 = vld [vmem:[#allocation5 + $0x3a0] ss:$24 sps:$4 sm:$0xff]  }
  0x56   :  { %1047 = vmatpush1.bf16.msra.mxu1 %v2672_v58  ;;  %978 = vmatprep.subr.bf16.mxu0 %v2676_v60  ;;  %v2751_v58 = vld [vmem:[#allocation5 + $0xa0] ss:$24 sps:$4 sm:$0xff]   ;;  %v2756_v60 = vld [vmem:[#allocation5 + $0x74] ss:$24 sps:$4 sm:$0xff]  }
  0x57   :  { %1048 = vmatprep.subr.bf16.mxu1 %v2680_v61  ;;  %v2790_v61 = vld [vmem:[#allocation5 + $0x370] ss:$24 sps:$4 sm:$0xff]  }
  0x59   :  { %979 = vmatpush2.bf16.msra.mxu0 %v2681_v63  ;;  %v2798_v63 = vld [vmem:[#allocation5 + $0x344] ss:$24 sps:$4 sm:$0xff]  }
  0x5a   :  { %1049 = vmatpush1.bf16.msra.mxu1 %v2678_v62  ;;  %980 = vmatprep.subr.bf16.mxu0 %v2682_v0  ;;  %v2759_v62 = vld [vmem:[#allocation5 + $0x44] ss:$24 sps:$4 sm:$0xff]   ;;  %v2757_v0 = vld [vmem:[#allocation5 + $0x40] ss:$24 sps:$4 sm:$0xff]  }
  0x5b   :  { %1050 = vmatprep.subr.bf16.mxu1 %v2686_v2  ;;  %v2796_v2 = vld [vmem:[#allocation5 + $0x340] ss:$24 sps:$4 sm:$0xff]  }
  0x5d   :  { %981 = vmatpush2.bf16.msra.mxu0 %v2687_v4  ;;  %v2804_v4 = vld [vmem:[#allocation5 + $0x314] ss:$24 sps:$4 sm:$0xff]  }
  0x5e   :  { %1051 = vmatpush1.bf16.msra.mxu1 %v2684_v3  ;;  %1079 = vmatprep.subr.bf16.mxu0 %v2696_v6  ;;  %v2765_v3 = vld [vmem:[#allocation5 + $0x14] ss:$24 sps:$4 sm:$0xff]   ;;  %v2802_v6 = vld [vmem:[#allocation5 + $0x310] ss:$24 sps:$4 sm:$0xff]  }
  0x5f   :  { %1052 = vmatprep.subr.bf16.mxu1 %v2693_v5  ;;  %v2763_v5 = vld [vmem:[#allocation5 + $0x10] ss:$24 sps:$4 sm:$0xff]  }
  0x60   :  { %983 = vmatmul.mubr.bf16.vlgmr.msra.gmra.mxu0 %v3023_v7 }
  0x61   :  { %1080 = vmatpush1.bf16.msra.mxu0 %v2694_v9  ;;  %1111 = vmatprep.mubr.bf16.mxu0 %v2938_v1  ;;  %v2769_v9 = vld [vmem:[#allocation5 + $0x2e0] ss:$24 sps:$4 sm:$0xff]  }
  0x62   :  { %1053 = vmatpush2.bf16.msra.mxu1 %v2691_v8  ;;  %1081 = vmatprep.subr.bf16.mxu0 %v2702_v11  ;;  %v2771_v8 = vld [vmem:[#allocation5 + $0x2e4] ss:$24 sps:$4 sm:$0xff]   ;;  %v2775_v11 = vld [vmem:[#allocation5 + $0x2b0] ss:$24 sps:$4 sm:$0xff]  }
  0x63   :  { %1054 = vmatprep.subr.bf16.mxu1 %v2699_v10  ;;  %v2777_v10 = vld [vmem:[#allocation5 + $0x2b4] ss:$24 sps:$4 sm:$0xff]  }
  0x65   :  { %1082 = vmatpush1.bf16.msra.mxu0 %v2700_v13  ;;  %v2781_v13 = vld [vmem:[#allocation5 + $0x280] ss:$24 sps:$4 sm:$0xff]  }
  0x66   :  { %1055 = vmatpush2.bf16.msra.mxu1 %v2697_v12  ;;  %1083 = vmatprep.subr.bf16.mxu0 %v2708_v15  ;;  %v2783_v12 = vld [vmem:[#allocation5 + $0x284] ss:$24 sps:$4 sm:$0xff]   ;;  %v2787_v15 = vld [vmem:[#allocation5 + $0x250] ss:$24 sps:$4 sm:$0xff]  }
  0x67   :  { %1056 = vmatprep.subr.bf16.mxu1 %v2705_v14  ;;  %v2789_v14 = vld [vmem:[#allocation5 + $0x254] ss:$24 sps:$4 sm:$0xff]  }
  0x69   :  { %1084 = vmatpush1.bf16.msra.mxu0 %v2706_v17  ;;  %v2793_v17 = vld [vmem:[#allocation5 + $0x220] ss:$24 sps:$4 sm:$0xff]  }
  0x6a   :  { %1057 = vmatpush2.bf16.msra.mxu1 %v2703_v16  ;;  %1085 = vmatprep.subr.bf16.mxu0 %v2714_v19  ;;  %v2795_v16 = vld [vmem:[#allocation5 + $0x224] ss:$24 sps:$4 sm:$0xff]   ;;  %v2799_v19 = vld [vmem:[#allocation5 + $0x1f0] ss:$24 sps:$4 sm:$0xff]  }
  0x6b   :  { %1058 = vmatprep.subr.bf16.mxu1 %v2711_v18  ;;  %v2801_v18 = vld [vmem:[#allocation5 + $0x1f4] ss:$24 sps:$4 sm:$0xff]  }
  0x6d   :  { %1086 = vmatpush1.bf16.msra.mxu0 %v2712_v21  ;;  %v2810_v21 = vld [vmem:[#allocation5 + $0x194] ss:$24 sps:$4 sm:$0xff]  }
  0x6e   :  { %1059 = vmatpush2.bf16.msra.mxu1 %v2709_v20  ;;  %1087 = vmatprep.subr.bf16.mxu0 %v2720_v23  ;;  %v2805_v20 = vld [vmem:[#allocation5 + $0x1c0] ss:$24 sps:$4 sm:$0xff]  }
  0x6f   :  { %1060 = vmatprep.subr.bf16.mxu1 %v2717_v22  ;;  %v2808_v22 = vld [vmem:[#allocation5 + $0x190] ss:$24 sps:$4 sm:$0xff]   ;;  %v1321_v23 = vld [vmem:[#allocation7 + $0x2d8] sm:$0xff] }
  0x71   :  { %1088 = vmatpush1.bf16.msra.mxu0 %v2718_v25  ;;  %v1323_v25 = vld [vmem:[#allocation7 + $0x2e8] sm:$0xff] }
  0x72   :  { %1061 = vmatpush2.bf16.msra.mxu1 %v2715_v24  ;;  %1089 = vmatprep.subr.bf16.mxu0 %v2726_v27  ;;  %v1320_v24 = vld [vmem:[#allocation7 + $0x2d0] sm:$0xff]  ;;  %v1322_v27 = vld [vmem:[#allocation7 + $0x2e0] sm:$0xff] }
  0x73   :  { %1062 = vmatprep.subr.bf16.mxu1 %v2723_v26  ;;  %v1315_v26 = vld [vmem:[#allocation7 + $0x2a8] sm:$0xff] }
  0x75   :  { %1090 = vmatpush1.bf16.msra.mxu0 %v2724_v29  ;;  %v1317_v29 = vld [vmem:[#allocation7 + $0x2b8] sm:$0xff] }
  0x76   :  { %1063 = vmatpush2.bf16.msra.mxu1 %v2721_v28  ;;  %1091 = vmatprep.subr.bf16.mxu0 %v2732_v31  ;;  %v1314_v28 = vld [vmem:[#allocation7 + $0x2a0] sm:$0xff]  ;;  %v1316_v31 = vld [vmem:[#allocation7 + $0x2b0] sm:$0xff] }
  0x77   :  { %1064 = vmatprep.subr.bf16.mxu1 %v2729_v30  ;;  %v1309_v30 = vld [vmem:[#allocation7 + $0x278] sm:$0xff] }
  0x79   :  { %1092 = vmatpush1.bf16.msra.mxu0 %v2730_v33  ;;  %v1311_v33 = vld [vmem:[#allocation7 + $0x288] sm:$0xff] }
  0x7a   :  { %1065 = vmatpush2.bf16.msra.mxu1 %v2727_v32  ;;  %1093 = vmatprep.subr.bf16.mxu0 %v2738_v35  ;;  %v1308_v32 = vld [vmem:[#allocation7 + $0x270] sm:$0xff]  ;;  %v1305_v35 = vld [vmem:[#allocation7 + $0x258] sm:$0xff] }
  0x7b   :  { %1066 = vmatprep.subr.bf16.mxu1 %v2735_v34  ;;  %v1310_v34 = vld [vmem:[#allocation7 + $0x280] sm:$0xff] }
  0x7d   :  { %1094 = vmatpush1.bf16.msra.mxu0 %v2736_v38  ;;  %v1304_v38 = vld [vmem:[#allocation7 + $0x250] sm:$0xff] }
  0x7e   :  { %1067 = vmatpush2.bf16.msra.mxu1 %v2733_v37  ;;  %1122 = vmatprep.subr.bf16.mxu0 %v2741_v39  ;;  %v1302_v37 = vld [vmem:[#allocation7 + $0x240] sm:$0xff]  ;;  %v1297_v39 = vld [vmem:[#allocation7 + $0x218] sm:$0xff] }
  0x7f   :  { %1165 = vmatprep.subr.bf16.mxu1 %v2762_v40  ;;  %v1299_v40 = vld [vmem:[#allocation7 + $0x228] sm:$0xff] }
  0x80   :  { %1112 = vmatmul.mubr.bf16.vlgmr.msra.gmra.mxu0 %v3010_v36 }
  0x81   :  { %1069 = vmatmul.mubr.bf16.vlgmr.msra.gmra.mxu1 %v3023_v7  ;;  %1123 = vmatpush1.bf16.msra.mxu0 %v2739_v41  ;;  %v1296_v41 = vld [vmem:[#allocation7 + $0x210] sm:$0xff] }
  0x82   :  { %1166 = vmatpush1.bf16.msra.mxu1 %v2760_v43  ;;  %1124 = vmatprep.subr.bf16.mxu0 %v2744_v42  ;;  %v1298_v42 = vld [vmem:[#allocation7 + $0x220] sm:$0xff]  ;;  %v1291_v43 = vld [vmem:[#allocation7 + $0x1e8] sm:$0xff] }
  0x83   :  { %1167 = vmatprep.subr.bf16.mxu1 %v2768_v44  ;;  %1197 = vmatprep.mubr.bf16.mxu1 %v2938_v1  ;;  %v2792_v1 = vld [vmem:[#allocation5 + $0x374] ss:$24 sps:$4 sm:$0xff]   ;;  %v1293_v44 = vld [vmem:[#allocation7 + $0x1f8] sm:$0xff] }
  0x84   :  { %1154 = vmatprep.mubr.bf16.mxu0 %v3016_v52  ;;  %v2754_v52 = vld [vmem:[#allocation5 + $0x70] ss:$24 sps:$4 sm:$0xff]  }
  0x85   :  { %1125 = vmatpush1.bf16.msra.mxu0 %v2742_v45  ;;  %v1290_v45 = vld [vmem:[#allocation7 + $0x1e0] sm:$0xff] }
  0x86   :  { %1168 = vmatpush1.bf16.msra.mxu1 %v2766_v46  ;;  %1126 = vmatprep.subr.bf16.mxu0 %v2747_v47  ;;  %v1292_v46 = vld [vmem:[#allocation7 + $0x1f0] sm:$0xff]  ;;  %v1285_v47 = vld [vmem:[#allocation7 + $0x1b8] sm:$0xff] }
  0x87   :  { %1169 = vmatprep.subr.bf16.mxu1 %v2774_v48  ;;  %v1287_v48 = vld [vmem:[#allocation7 + $0x1c8] sm:$0xff] }
  0x89   :  { %1127 = vmatpush1.bf16.msra.mxu0 %v2745_v49  ;;  %v1284_v49 = vld [vmem:[#allocation7 + $0x1b0] sm:$0xff] }
  0x8a   :  { %1170 = vmatpush1.bf16.msra.mxu1 %v2772_v50  ;;  %1128 = vmatprep.subr.bf16.mxu0 %v2750_v51  ;;  %v1286_v50 = vld [vmem:[#allocation7 + $0x1c0] sm:$0xff]  ;;  %v1279_v51 = vld [vmem:[#allocation7 + $0x188] sm:$0xff] }
  0x8b   :  { %1171 = vmatprep.subr.bf16.mxu1 %v2780_v53  ;;  %v1281_v53 = vld [vmem:[#allocation7 + $0x198] sm:$0xff] }
  0x8d   :  { %1129 = vmatpush1.bf16.msra.mxu0 %v2748_v54  ;;  %v1278_v54 = vld [vmem:[#allocation7 + $0x180] sm:$0xff] }
  0x8e   :  { %1172 = vmatpush1.bf16.msra.mxu1 %v2778_v55  ;;  %1130 = vmatprep.subr.bf16.mxu0 %v2753_v56  ;;  %v1280_v55 = vld [vmem:[#allocation7 + $0x190] sm:$0xff]  ;;  %v1273_v56 = vld [vmem:[#allocation7 + $0x158] sm:$0xff] }
  0x8f   :  { %1173 = vmatprep.subr.bf16.mxu1 %v2786_v57  ;;  %v1275_v57 = vld [vmem:[#allocation7 + $0x168] sm:$0xff] }
  0x91   :  { %1131 = vmatpush1.bf16.msra.mxu0 %v2751_v58  ;;  %v1272_v58 = vld [vmem:[#allocation7 + $0x150] sm:$0xff] }
  0x92   :  { %1174 = vmatpush1.bf16.msra.mxu1 %v2784_v59  ;;  %1132 = vmatprep.subr.bf16.mxu0 %v2756_v60  ;;  %v1274_v59 = vld [vmem:[#allocation7 + $0x160] sm:$0xff]  ;;  %v1267_v60 = vld [vmem:[#allocation7 + $0x128] sm:$0xff] }
  0x93   :  { %1175 = vmatprep.subr.bf16.mxu1 %v2792_v1  ;;  %v1269_v1 = vld [vmem:[#allocation7 + $0x138] sm:$0xff] }
  0x95   :  { %1133 = vmatpush1.bf16.msra.mxu0 %v2754_v52  ;;  %v1266_v52 = vld [vmem:[#allocation7 + $0x120] sm:$0xff] }
  0x96   :  { %1176 = vmatpush1.bf16.msra.mxu1 %v2790_v61  ;;  %1134 = vmatprep.subr.bf16.mxu0 %v2759_v62  ;;  %v1268_v61 = vld [vmem:[#allocation7 + $0x130] sm:$0xff]  ;;  %v1261_v62 = vld [vmem:[#allocation7 + $0xf8] sm:$0xff] }
  0x97   :  { %1177 = vmatprep.subr.bf16.mxu1 %v2798_v63  ;;  %v1260_v63 = vld [vmem:[#allocation7 + $0xf0] sm:$0xff] }
  0x99   :  { %1135 = vmatpush1.bf16.msra.mxu0 %v2757_v0  ;;  %v1263_v0 = vld [vmem:[#allocation7 + $0x108] sm:$0xff] }
  0x9a   :  { %1178 = vmatpush1.bf16.msra.mxu1 %v2796_v2  ;;  %1136 = vmatprep.subr.bf16.mxu0 %v2765_v3  ;;  %v1255_v2 = vld [vmem:[#allocation7 + $0xc8] sm:$0xff]  ;;  %v1262_v3 = vld [vmem:[#allocation7 + $0x100] sm:$0xff] }
  0x9b   :  { %1179 = vmatprep.subr.bf16.mxu1 %v2804_v4  ;;  %v1254_v4 = vld [vmem:[#allocation7 + $0xc0] sm:$0xff] }
  0x9d   :  { %1137 = vmatpush1.bf16.msra.mxu0 %v2763_v5  ;;  %v1257_v5 = vld [vmem:[#allocation7 + $0xd8] sm:$0xff] }
  0x9e   :  { %1180 = vmatpush1.bf16.msra.mxu1 %v2802_v6  ;;  %1138 = vmatprep.subr.bf16.mxu0 %v2771_v8  ;;  %v1249_v6 = vld [vmem:[#allocation7 + $0x98] sm:$0xff]  ;;  %v1256_v8 = vld [vmem:[#allocation7 + $0xd0] sm:$0xff] }
  0x9f   :  { %1492 = vmatprep.subr.mxu1 %v1321_v23  ;;  %v1232_v23 = vld [vmem:[#allocation7 + $0x10] sm:$0xff] }
  0xa1   :  { %1198 = vmatmul.mubr.bf16.vlgmr.msra.gmra.mxu1 %v3010_v36  ;;  %1139 = vmatpush2.bf16.msra.mxu0 %v2769_v9  ;;  %v2807_v36 = vld [vmem:[#allocation5 + $0x1c4] ss:$24 sps:$4 sm:$0xff]   ;;  %v1248_v9 = vld [vmem:[#allocation7 + $0x90] sm:$0xff] }
  0xa2   :  { %1140 = vmatprep.subr.bf16.mxu0 %v2777_v10  ;;  %1493 = vmatpush1.msra.mxu1 %v1320_v24  ;;  %v1251_v10 = vld [vmem:[#allocation7 + $0xa8] sm:$0xff]  ;;  %v1416_v24 = vld [vmem:[#allocation7 + $0x5d0] sm:$0xff] }
  0xa3   :  { %1494 = vmatprep.subr.mxu1 %v1315_v26  ;;  %v1411_v26 = vld [vmem:[#allocation7 + $0x5a8] sm:$0xff] }
  0xa4   :  { %1495 = vmatpush1.msra.mxu1 %v1314_v28  ;;  %v1410_v28 = vld [vmem:[#allocation7 + $0x5a0] sm:$0xff] }
  0xa5   :  { %1141 = vmatpush2.bf16.msra.mxu0 %v2775_v11  ;;  %1496 = vmatprep.subr.mxu1 %v1309_v30  ;;  %v1243_v11 = vld [vmem:[#allocation7 + $0x68] sm:$0xff]  ;;  %v1405_v30 = vld [vmem:[#allocation7 + $0x578] sm:$0xff] }
  0xa6   :  { %1142 = vmatprep.subr.bf16.mxu0 %v2783_v12  ;;  %1497 = vmatpush1.msra.mxu1 %v1308_v32  ;;  %v1250_v12 = vld [vmem:[#allocation7 + $0xa0] sm:$0xff]  ;;  %v1404_v32 = vld [vmem:[#allocation7 + $0x570] sm:$0xff] }
  0xa9   :  { %1143 = vmatpush2.bf16.msra.mxu0 %v2781_v13  ;;  %v1242_v13 = vld [vmem:[#allocation7 + $0x60] sm:$0xff] }
  0xaa   :  { %1144 = vmatprep.subr.bf16.mxu0 %v2789_v14  ;;  %v1245_v14 = vld [vmem:[#allocation7 + $0x78] sm:$0xff] }
  0xad   :  { %1145 = vmatpush2.bf16.msra.mxu0 %v2787_v15  ;;  %v1237_v15 = vld [vmem:[#allocation7 + $0x38] sm:$0xff] }
  0xae   :  { %1146 = vmatprep.subr.bf16.mxu0 %v2795_v16  ;;  %v1244_v16 = vld [vmem:[#allocation7 + $0x70] sm:$0xff] }
  0xb1   :  { %1147 = vmatpush2.bf16.msra.mxu0 %v2793_v17  ;;  %v1236_v17 = vld [vmem:[#allocation7 + $0x30] sm:$0xff] }
  0xb2   :  { %1148 = vmatprep.subr.bf16.mxu0 %v2801_v18  ;;  %v1239_v18 = vld [vmem:[#allocation7 + $0x48] sm:$0xff] }
  0xb5   :  { %1149 = vmatpush2.bf16.msra.mxu0 %v2799_v19  ;;  %v1231_v19 = vld [vmem:[#allocation7 + $0x8] sm:$0xff] }
  0xb6   :  { %1150 = vmatprep.subr.bf16.mxu0 %v2807_v36  ;;  %v1238_v36 = vld [vmem:[#allocation7 + $0x40] sm:$0xff] }
  0xb9   :  { %1151 = vmatpush2.bf16.msra.mxu0 %v2805_v20  ;;  %v1230_v20 = vld [vmem:[#allocation7] sm:$0xff] }
  0xba   :  { %1152 = vmatprep.subr.bf16.mxu0 %v2810_v21  ;;  %v1233_v21 = vld [vmem:[#allocation7 + $0x18] sm:$0xff] }
  0xbd   :  { %1153 = vmatpush2.bf16.msra.mxu0 %v2808_v22  ;;  %v1417_v22 = vld [vmem:[#allocation7 + $0x5d8] sm:$0xff] }
  0xbe   :  { %1563 = vmatprep.subr.mxu0 %v1323_v25  ;;  %v1419_v25 = vld [vmem:[#allocation7 + $0x5e8] sm:$0xff] }
  0xc0   :  { %1155 = vmatmul.mubr.bf16.vlgmr.msra.gmra.mxu0 %v3023_v7  ;;  %v1303_v7 = vld [vmem:[#allocation7 + $0x248] sm:$0xff] }
  0xc1   :  { %1564 = vmatpush1.msra.mxu0 %v1322_v27  ;;  %1498 = vmatprep.subr.mxu1 %v1303_v7  ;;  %v1418_v27 = vld [vmem:[#allocation7 + $0x5e0] sm:$0xff]  ;;  %v1399_v7 = vld [vmem:[#allocation7 + $0x548] sm:$0xff] }
  0xc2   :  { %1565 = vmatprep.subr.mxu0 %v1317_v29  ;;  %1499 = vmatpush1.msra.mxu1 %v1302_v37  ;;  %v1413_v29 = vld [vmem:[#allocation7 + $0x5b8] sm:$0xff] }
  0xc3   :  { %1566 = vmatpush1.msra.mxu0 %v1316_v31  ;;  %1500 = vmatprep.subr.mxu1 %v1297_v39  ;;  %v1412_v31 = vld [vmem:[#allocation7 + $0x5b0] sm:$0xff]  ;;  %v1401_v37 = vld [vmem:[#allocation7 + $0x558] sm:$0xff] }
  0xc4   :  { %1567 = vmatprep.subr.mxu0 %v1311_v33  ;;  %1501 = vmatpush1.msra.mxu1 %v1296_v41  ;;  %v1407_v33 = vld [vmem:[#allocation7 + $0x588] sm:$0xff]  ;;  %v1400_v39 = vld [vmem:[#allocation7 + $0x550] sm:$0xff] }
  0xc5   :  { %1568 = vmatpush1.msra.mxu0 %v1310_v34  ;;  %1502 = vmatprep.subr.mxu1 %v1291_v43  ;;  %v1406_v34 = vld [vmem:[#allocation7 + $0x580] sm:$0xff]  ;;  %v1395_v41 = vld [vmem:[#allocation7 + $0x528] sm:$0xff] }
  0xc6   :  { %1569 = vmatprep.subr.mxu0 %v1305_v35  ;;  %1503 = vmatpush1.msra.mxu1 %v1290_v45  ;;  %v1398_v35 = vld [vmem:[#allocation7 + $0x540] sm:$0xff]  ;;  %v1389_v45 = vld [vmem:[#allocation7 + $0x4f8] sm:$0xff] }
  0xc7   :  { %1570 = vmatpush1.msra.mxu0 %v1304_v38  ;;  %1504 = vmatprep.subr.mxu1 %v1285_v47  ;;  %v1393_v38 = vld [vmem:[#allocation7 + $0x518] sm:$0xff]  ;;  %v1394_v43 = vld [vmem:[#allocation7 + $0x520] sm:$0xff]  ;;  %v1388_v47 = vld [vmem:[#allocation7 + $0x4f0] sm:$0xff] }
  0xc8   :  { %1571 = vmatprep.subr.mxu0 %v1299_v40  ;;  %1505 = vmatpush1.msra.mxu1 %v1284_v49  ;;  %v1392_v40 = vld [vmem:[#allocation7 + $0x510] sm:$0xff]  ;;  %v1383_v49 = vld [vmem:[#allocation7 + $0x4c8] sm:$0xff] }
  0xc9   :  { %1572 = vmatpush1.msra.mxu0 %v1298_v42  ;;  %1506 = vmatprep.subr.mxu1 %v1279_v51  ;;  %v1387_v42 = vld [vmem:[#allocation7 + $0x4e8] sm:$0xff]  ;;  %v1382_v51 = vld [vmem:[#allocation7 + $0x4c0] sm:$0xff] }
  0xca   :  { %1573 = vmatprep.subr.mxu0 %v1293_v44  ;;  %1507 = vmatpush1.msra.mxu1 %v1278_v54  ;;  %v1386_v44 = vld [vmem:[#allocation7 + $0x4e0] sm:$0xff]  ;;  %v1377_v54 = vld [vmem:[#allocation7 + $0x498] sm:$0xff] }
  0xcb   :  { %1574 = vmatpush1.msra.mxu0 %v1292_v46  ;;  %1508 = vmatprep.subr.mxu1 %v1273_v56  ;;  %v1381_v46 = vld [vmem:[#allocation7 + $0x4b8] sm:$0xff] }
  0xcc   :  { %1575 = vmatprep.subr.mxu0 %v1287_v48  ;;  %1509 = vmatpush1.msra.mxu1 %v1272_v58  ;;  %v1380_v48 = vld [vmem:[#allocation7 + $0x4b0] sm:$0xff] }
  0xcd   :  { %1576 = vmatpush1.msra.mxu0 %v1286_v50  ;;  %1510 = vmatprep.subr.mxu1 %v1267_v60  ;;  %v1375_v50 = vld [vmem:[#allocation7 + $0x488] sm:$0xff]  ;;  %v1368_v58 = vld [vmem:[#allocation7 + $0x450] sm:$0xff] }
  0xce   :  { %1577 = vmatprep.subr.mxu0 %v1281_v53  ;;  %1511 = vmatpush1.msra.mxu1 %v1266_v52  ;;  %v1374_v53 = vld [vmem:[#allocation7 + $0x480] sm:$0xff]  ;;  %v1363_v60 = vld [vmem:[#allocation7 + $0x428] sm:$0xff] }
  0xcf   :  { %1578 = vmatpush1.msra.mxu0 %v1280_v55  ;;  %1512 = vmatprep.subr.mxu1 %v1261_v62  ;;  %v1369_v55 = vld [vmem:[#allocation7 + $0x458] sm:$0xff]  ;;  %v1362_v52 = vld [vmem:[#allocation7 + $0x420] sm:$0xff] }
  0xd0   :  { %1579 = vmatprep.subr.mxu0 %v1275_v57  ;;  %1513 = vmatpush1.msra.mxu1 %v1260_v63  ;;  %v1376_v57 = vld [vmem:[#allocation7 + $0x490] sm:$0xff]  ;;  %v1357_v62 = vld [vmem:[#allocation7 + $0x3f8] sm:$0xff] }
  0xd1   :  { %1580 = vmatpush1.msra.mxu0 %v1274_v59  ;;  %1514 = vmatprep.subr.mxu1 %v1255_v2  ;;  %v1371_v59 = vld [vmem:[#allocation7 + $0x468] sm:$0xff]  ;;  %v1364_v63 = vld [vmem:[#allocation7 + $0x430] sm:$0xff] }
  0xd2   :  { %1581 = vmatprep.subr.mxu0 %v1269_v1  ;;  %1515 = vmatpush1.msra.mxu1 %v1254_v4  ;;  %v1370_v1 = vld [vmem:[#allocation7 + $0x460] sm:$0xff]  ;;  %v1359_v2 = vld [vmem:[#allocation7 + $0x408] sm:$0xff] }
  0xd3   :  { %1582 = vmatpush1.msra.mxu0 %v1268_v61  ;;  %1516 = vmatprep.subr.mxu1 %v1249_v6  ;;  %v1365_v61 = vld [vmem:[#allocation7 + $0x438] sm:$0xff]  ;;  %v1351_v4 = vld [vmem:[#allocation7 + $0x3c8] sm:$0xff]  ;;  %v1350_v6 = vld [vmem:[#allocation7 + $0x3c0] sm:$0xff] }
  0xd4   :  { %1583 = vmatprep.subr.mxu0 %v1263_v0  ;;  %1517 = vmatpush1.msra.mxu1 %v1248_v9  ;;  %v1356_v0 = vld [vmem:[#allocation7 + $0x3f0] sm:$0xff] }
  0xd5   :  { %1584 = vmatpush1.msra.mxu0 %v1262_v3  ;;  %1518 = vmatprep.subr.mxu1 %v1243_v11  ;;  %v1352_v11 = vld [vmem:[#allocation7 + $0x3d0] sm:$0xff] }
  0xd6   :  { %1585 = vmatprep.subr.mxu0 %v1257_v5  ;;  %1519 = vmatpush1.msra.mxu1 %v1242_v13  ;;  %v1358_v5 = vld [vmem:[#allocation7 + $0x400] sm:$0xff]  ;;  %v1344_v13 = vld [vmem:[#allocation7 + $0x390] sm:$0xff] }
  0xd7   :  { %1586 = vmatpush1.msra.mxu0 %v1256_v8  ;;  %1520 = vmatprep.subr.mxu1 %v1237_v15  ;;  %v1353_v8 = vld [vmem:[#allocation7 + $0x3d8] sm:$0xff] }
  0xd8   :  { %1587 = vmatprep.subr.mxu0 %v1251_v10  ;;  %1521 = vmatpush1.msra.mxu1 %v1236_v17  ;;  %v1345_v10 = vld [vmem:[#allocation7 + $0x398] sm:$0xff]  ;;  %v1339_v17 = vld [vmem:[#allocation7 + $0x368] sm:$0xff] }
  0xd9   :  { %1588 = vmatpush1.msra.mxu0 %v1250_v12  ;;  %1522 = vmatprep.subr.mxu1 %v1231_v19 }
  0xda   :  { %1589 = vmatprep.subr.mxu0 %v1245_v14  ;;  %1523 = vmatpush1.msra.mxu1 %v1230_v20  ;;  %v1347_v14 = vld [vmem:[#allocation7 + $0x3a8] sm:$0xff]  ;;  %v1341_v20 = vld [vmem:[#allocation7 + $0x378] sm:$0xff] }
  0xdb   :  { %1590 = vmatpush1.msra.mxu0 %v1244_v16  ;;  %1524 = vmatprep.subr.mxu1 %v1417_v22  ;;  %v1333_v22 = vld [vmem:[#allocation7 + $0x338] sm:$0xff] }
  0xdc   :  { %1591 = vmatprep.subr.mxu0 %v1239_v18  ;;  %1525 = vmatpush2.msra.mxu1 %v1416_v24  ;;  %v1346_v18 = vld [vmem:[#allocation7 + $0x3a0] sm:$0xff] }
  0xdd   :  { %1592 = vmatpush1.msra.mxu0 %v1238_v36  ;;  %1526 = vmatprep.subr.mxu1 %v1411_v26  ;;  %v1338_v36 = vld [vmem:[#allocation7 + $0x360] sm:$0xff]  ;;  %v1335_v26 = vld [vmem:[#allocation7 + $0x348] sm:$0xff] }
  0xde   :  { %1593 = vmatprep.subr.mxu0 %v1233_v21  ;;  %1527 = vmatpush2.msra.mxu1 %v1410_v28 }
  0xdf   :  { %1594 = vmatpush1.msra.mxu0 %v1232_v23  ;;  %1528 = vmatprep.subr.mxu1 %v1405_v30  ;;  %v1340_v23 = vld [vmem:[#allocation7 + $0x370] sm:$0xff]  ;;  %v1334_v30 = vld [vmem:[#allocation7 + $0x340] sm:$0xff] }
  0xe0   :  { %1595 = vmatprep.subr.mxu0 %v1419_v25  ;;  %1529 = vmatpush2.msra.mxu1 %v1404_v32  ;;  %v1332_v25 = vld [vmem:[#allocation7 + $0x330] sm:$0xff]  ;;  %v1326_v32 = vld [vmem:[#allocation7 + $0x300] sm:$0xff] }
  0xe1   :  { %1596 = vmatpush2.msra.mxu0 %v1418_v27  ;;  %1530 = vmatprep.subr.mxu1 %v1399_v7 }
  0xe2   :  { %1597 = vmatprep.subr.mxu0 %v1413_v29  ;;  %1531 = vmatpush2.msra.mxu1 %v1398_v35  ;;  %v1327_v29 = vld [vmem:[#allocation7 + $0x308] sm:$0xff]  ;;  %v1325_v35 = vld [vmem:[#allocation7 + $0x2f8] sm:$0xff] }
  0xe3   :  { %1598 = vmatpush2.msra.mxu0 %v1412_v31  ;;  %1532 = vmatprep.subr.mxu1 %v1393_v38 }
  0xe4   :  { %1599 = vmatprep.subr.mxu0 %v1407_v33  ;;  %1533 = vmatpush2.msra.mxu1 %v1392_v40  ;;  %v1329_v33 = vld [vmem:[#allocation7 + $0x318] sm:$0xff] }
  0xe5   :  { %1600 = vmatpush2.msra.mxu0 %v1406_v34  ;;  %1534 = vmatprep.subr.mxu1 %v1387_v42  ;;  %v1328_v34 = vld [vmem:[#allocation7 + $0x310] sm:$0xff] }
  0xe6   :  { %1601 = vmatprep.subr.mxu0 %v1401_v37  ;;  %1535 = vmatpush2.msra.mxu1 %v1386_v44 }
  0xe7   :  { %1602 = vmatpush2.msra.mxu0 %v1400_v39  ;;  %1536 = vmatprep.subr.mxu1 %v1381_v46 }
  0xe8   :  { %1603 = vmatprep.subr.mxu0 %v1395_v41  ;;  %1537 = vmatpush2.msra.mxu1 %v1380_v48 }
  0xe9   :  { %1604 = vmatpush2.msra.mxu0 %v1394_v43  ;;  %1538 = vmatprep.subr.mxu1 %v1375_v50  ;;  %v3040_v43 = vld [vmem:[%s3234_s3] ss:$0 sm:$0xff] }
  0xea   :  { %1605 = vmatprep.subr.mxu0 %v1389_v45  ;;  %1539 = vmatpush2.msra.mxu1 %v1374_v53 }
  0xeb   :  { %1606 = vmatpush2.msra.mxu0 %v1388_v47  ;;  %1540 = vmatprep.subr.mxu1 %v1369_v55 }
  0xec   :  { %1607 = vmatprep.subr.mxu0 %v1383_v49  ;;  %1541 = vmatpush2.msra.mxu1 %v1368_v58 }
  0xed   :  { %1608 = vmatpush2.msra.mxu0 %v1382_v51  ;;  %1542 = vmatprep.subr.mxu1 %v1363_v60 }
  0xee   :  { %1609 = vmatprep.subr.mxu0 %v1377_v54  ;;  %1543 = vmatpush2.msra.mxu1 %v1362_v52 }
  0xef   :  { %1610 = vmatpush2.msra.mxu0 %v1376_v57  ;;  %1544 = vmatprep.subr.mxu1 %v1357_v62 }
  0xf0   :  { %1611 = vmatprep.subr.mxu0 %v1371_v59  ;;  %1545 = vmatpush2.msra.mxu1 %v1356_v0 }
  0xf1   :  { %1612 = vmatpush2.msra.mxu0 %v1370_v1  ;;  %1546 = vmatprep.subr.mxu1 %v1351_v4 }
  0xf2   :  { %1613 = vmatprep.subr.mxu0 %v1365_v61  ;;  %1547 = vmatpush2.msra.mxu1 %v1350_v6 }
  0xf3   :  { %1614 = vmatpush2.msra.mxu0 %v1364_v63  ;;  %1548 = vmatprep.subr.mxu1 %v1345_v10 }
  0xf4   :  { %1615 = vmatprep.subr.mxu0 %v1359_v2  ;;  %1549 = vmatpush2.msra.mxu1 %v1344_v13 }
  0xf5   :  { %1616 = vmatpush2.msra.mxu0 %v1358_v5  ;;  %1550 = vmatprep.subr.mxu1 %v1339_v17 }
  0xf6   :  { %1617 = vmatprep.subr.mxu0 %v1353_v8  ;;  %1551 = vmatpush2.msra.mxu1 %v1338_v36 }
  0xf7   :  { %1618 = vmatpush2.msra.mxu0 %v1352_v11  ;;  %1552 = vmatprep.subr.mxu1 %v1333_v22 }
  0xf8   :  { %1619 = vmatprep.subr.mxu0 %v1347_v14  ;;  %1553 = vmatpush2.msra.mxu1 %v1332_v25 }
  0xf9   :  { %1620 = vmatpush2.msra.mxu0 %v1346_v18  ;;  %1554 = vmatprep.subr.mxu1 %v1327_v29  ;;  %v1318_v29 = vld [vmem:[#allocation7 + $0x2c0] sm:$0xff] }
  0xfa   :  { %1621 = vmatprep.subr.mxu0 %v1341_v20  ;;  %1555 = vmatpush2.msra.mxu1 %v1326_v32  ;;  %v1312_v32 = vld [vmem:[#allocation7 + $0x290] sm:$0xff] }
  0xfb   :  { %1622 = vmatpush2.msra.mxu0 %v1340_v23  ;;  %1634 = vmatprep.subr.mxu1 %v1325_v35  ;;  %v1300_v35 = vld [vmem:[#allocation7 + $0x230] sm:$0xff] }
  0xfc   :  { %1623 = vmatprep.subr.mxu0 %v1335_v26  ;;  %v1324_v26 = vld [vmem:[#allocation7 + $0x2f0] sm:$0xff] }
  0xfd   :  { %1624 = vmatpush2.msra.mxu0 %v1334_v30  ;;  %v1313_v30 = vld [vmem:[#allocation7 + $0x298] sm:$0xff] }
  0xfe   :  { %1625 = vmatprep.subr.mxu0 %v1329_v33  ;;  %v1307_v33 = vld [vmem:[#allocation7 + $0x268] sm:$0xff] }
  0xff   :  { %1626 = vmatpush2.msra.mxu0 %v1328_v34  ;;  %v1301_v34 = vld [vmem:[#allocation7 + $0x238] sm:$0xff] }
 0x101   :  { %v1027_v56 = vpop.f32.mrf.mxu1 }
 0x103   :  { %v1029_v3 = vpop.f32.mrf.mxu1 }
 0x105   :  { %v1031_v15 = vpop.f32.mrf.mxu1 }
 0x107   :  { %v1033_v27 = vpop.f32.mrf.mxu1 }
 0x120   :  { %v984_v9 = vpop.f32.mrf.mxu0 }
 0x121   :  { %v1028_v12 = vadd.f32 %v1027_v56, %v984_v9 }
 0x122   :  { %v986_v16 = vpop.f32.mrf.mxu0 }
 0x123   :  { %v2436_v19 = vmul.f32 -1.442695, %v1028_v12  ;;  %v1030_v7 = vadd.f32 %v1029_v3, %v986_v16  ;;  %v3058_v16 = vld [vmem:[%s3235_s4] ss:$0 sm:$0xff] }
 0x124   :  { %v988_v21 = vpop.f32.mrf.mxu0 }
 0x125   :  { %2848 = vpow2.f32 %v2436_v19  ;;  %v3033_v24 = vadd.f32 %v1031_v15, %v988_v21  ;;  %v2437_v37 = vmul.f32 -1.442695, %v1030_v7  ;;  %v1306_v7 = vld [vmem:[#allocation7 + $0x260] sm:$0xff] }
 0x126   :  { %v990_v28 = vpop.f32.mrf.mxu0 }
 0x127   :  { %v3035_v31 = vadd.f32 %v1033_v27, %v990_v28  ;;  %2850 = vpow2.f32 %v2437_v37  ;;  %v1319_v28 = vld [vmem:[#allocation7 + $0x2c8] sm:$0xff] }
 0x128   :  { %v1295_v37 = vld [vmem:[#allocation7 + $0x208] sm:$0xff] }
 0x132   :  { %v2849_v38 = vpop.eup %2848 }
 0x133   :  { %v1430_v39 = vadd.f32 1.0, %v2849_v38  ;;  %v1294_v38 = vld [vmem:[#allocation7 + $0x200] sm:$0xff] }
 0x134   :  { %v2851_v40 = vpop.eup %2850 }
 0x135   :  { %2852 = vrcp.f32 %v1430_v39  ;;  %v1436_v46 = vadd.f32 1.0, %v2851_v40  ;;  %v1289_v39 = vld [vmem:[#allocation7 + $0x1d8] sm:$0xff]  ;;  %v1288_v40 = vld [vmem:[#allocation7 + $0x1d0] sm:$0xff] }
 0x137   :  { %2854 = vrcp.f32 %v1436_v46  ;;  %v1271_v46 = vld [vmem:[#allocation7 + $0x148] sm:$0xff] }
 0x140   :  { %v1113_v42 = vpop.f32.mrf.mxu0 }
 0x141   :  { %v1070_v41 = vpop.f32.mrf.mxu1 }
 0x142   :  { %v1114_v44 = vadd.f32 %v1113_v42, %v1070_v41  ;;  %v2853_v45 = vpop.eup %2852  ;;  %v1115_v48 = vpop.f32.mrf.mxu0  ;;  %v1283_v41 = vld [vmem:[#allocation7 + $0x1a8] sm:$0xff]  ;;  %v1282_v42 = vld [vmem:[#allocation7 + $0x1a0] sm:$0xff] }
 0x143   :  { %v1072_v47 = vpop.f32.mrf.mxu1  ;;  %v1445_v49 = vmul.f32 %v2853_v45, %v3040_v43  ;;  %v1276_v45 = vld [vmem:[#allocation7 + $0x170] sm:$0xff] }
 0x144   :  { %v3043_v50 = vadd.f32 %v1115_v48, %v1072_v47  ;;  %v1117_v53 = vpop.f32.mrf.mxu0  ;;  %v2855_v56 = vpop.eup %2854  ;;  %v1270_v47 = vld [vmem:[#allocation7 + $0x140] sm:$0xff]  ;;  %v1265_v48 = vld [vmem:[#allocation7 + $0x118] sm:$0xff] }
 0x145   :  { %v1074_v51 = vpop.f32.mrf.mxu1  ;;  %v1446_v54 = vadd.f32 %v1445_v49, %v1114_v44  ;;  %v1277_v44 = vld [vmem:[#allocation7 + $0x178] sm:$0xff]  ;;  %v1264_v49 = vld [vmem:[#allocation7 + $0x110] sm:$0xff] }
 0x146   :  { %v3045_v55 = vadd.f32 %v1117_v53, %v1074_v51  ;;  %v1119_v52 = vpop.f32.mrf.mxu0  ;;  %v1259_v51 = vld [vmem:[#allocation7 + $0xe8] sm:$0xff]  ;;  %v1258_v53 = vld [vmem:[#allocation7 + $0xe0] sm:$0xff] }
 0x147   :  { %2856 = vtanh.f32 %v1446_v54  ;;  %v1076_v1 = vpop.f32.mrf.mxu1  ;;  %v1253_v54 = vld [vmem:[#allocation7 + $0xb8] sm:$0xff] }
 0x148   :  { %v1120_v61 = vadd.f32 %v1119_v52, %v1076_v1  ;;  %v1240_v1 = vld [vmem:[#allocation7 + $0x50] sm:$0xff]  ;;  %v1235_v52 = vld [vmem:[#allocation7 + $0x28] sm:$0xff] }
 0x14a   :  { %v2439_v62 = vmul.f32 -1.442695, %v1120_v61  ;;  %v1234_v61 = vld [vmem:[#allocation7 + $0x20] sm:$0xff] }
 0x14c   :  { %2858 = vpow2.f32 %v2439_v62  ;;  %v1421_v62 = vld [vmem:[#allocation7 + $0x5f8] sm:$0xff] }
 0x154   :  { %v2857_v57 = vpop.eup %2856 }
 0x155   :  { %v1448_v58 = vmul.f32 %v2857_v57, %v2855_v56  ;;  %v1252_v56 = vld [vmem:[#allocation7 + $0xb0] sm:$0xff] }
 0x157   :  { %v3047_v59 = vsub.f32 %v2857_v57, %v1448_v58  ;;  %v1247_v57 = vld [vmem:[#allocation7 + $0x88] sm:$0xff]  ;;  %v1246_v58 = vld [vmem:[#allocation7 + $0x80] sm:$0xff] }
 0x159   :  { %v1476_v60 = vpack.c.bf16 %v3047_v59, %v3047_v59  ;;  %v2859_v63 = vpop.eup %2858 }
 0x15a   :  { %v1456_v2 = vadd.f32 1.0, %v2859_v63  ;;  %v1420_v63 = vld [vmem:[#allocation7 + $0x5f0] sm:$0xff] }
 0x15b   :  { %1477 = vst [vmem:[#allocation3] sm:$0xf] %v1476_v60  ;;  %v1241_v60 = vld [vmem:[#allocation7 + $0x58] sm:$0xff] }
 0x15c   :  { %2860 = vrcp.f32 %v1456_v2  ;;  %v1414_v2 = vld [vmem:[#allocation7 + $0x5c0] sm:$0xff] }
 0x161   :  { %v1199_v0 = vpop.f32.mrf.mxu1 }
 0x163   :  { %v1201_v3 = vpop.f32.mrf.mxu1 }
 0x165   :  { %v1203_v9 = vpop.f32.mrf.mxu1 }
 0x167   :  { %v1205_v15 = vpop.f32.mrf.mxu1 }
 0x169   :  { %v2861_v14 = vpop.eup %2860 }
 0x16a   :  { %v1471_v18 = vmul.f32 %v2861_v14, %v3058_v16  ;;  %v1385_v14 = vld [vmem:[#allocation7 + $0x4d8] sm:$0xff] }
 0x180   :  { %v1156_v4 = vpop.f32.mrf.mxu0 }
 0x181   :  { %v3051_v5 = vadd.f32 %v1199_v0, %v1156_v4  ;;  %v1415_v0 = vld [vmem:[#allocation7 + $0x5c8] sm:$0xff]  ;;  %v1408_v4 = vld [vmem:[#allocation7 + $0x590] sm:$0xff] }
 0x182   :  { %v1158_v6 = vpop.f32.mrf.mxu0 }
 0x183   :  { %v3053_v8 = vadd.f32 %v1201_v3, %v1158_v6  ;;  %v1409_v3 = vld [vmem:[#allocation7 + $0x598] sm:$0xff]  ;;  %v1403_v6 = vld [vmem:[#allocation7 + $0x568] sm:$0xff] }
 0x184   :  { %v1160_v10 = vpop.f32.mrf.mxu0 }
 0x185   :  { %v1204_v11 = vadd.f32 %v1203_v9, %v1160_v10  ;;  %v1402_v9 = vld [vmem:[#allocation7 + $0x560] sm:$0xff]  ;;  %v1397_v10 = vld [vmem:[#allocation7 + $0x538] sm:$0xff] }
 0x186   :  { %v1162_v13 = vpop.f32.mrf.mxu0 }
 0x187   :  { %v2440_v12 = vmul.f32 -1.442695, %v1204_v11  ;;  %v1206_v17 = vadd.f32 %v1205_v15, %v1162_v13  ;;  %v1396_v11 = vld [vmem:[#allocation7 + $0x530] sm:$0xff]  ;;  %v1390_v13 = vld [vmem:[#allocation7 + $0x500] sm:$0xff] }
 0x188   :  { %v1384_v15 = vld [vmem:[#allocation7 + $0x4d0] sm:$0xff] }
 0x189   :  { %2862 = vpow2.f32 %v2440_v12  ;;  %v1472_v19 = vadd.f32 %v1471_v18, %v1206_v17  ;;  %v1391_v12 = vld [vmem:[#allocation7 + $0x508] sm:$0xff]  ;;  %v1378_v18 = vld [vmem:[#allocation7 + $0x4a0] sm:$0xff] }
 0x18a   :  { %v1379_v17 = vld [vmem:[#allocation7 + $0x4a8] sm:$0xff] }
 0x18b   :  { %2864 = vtanh.f32 %v1472_v19  ;;  %v1373_v19 = vld [vmem:[#allocation7 + $0x478] sm:$0xff] }
 0x196   :  { %v2863_v36 = vpop.eup %2862 }
 0x197   :  { %v1462_v20 = vadd.f32 1.0, %v2863_v36  ;;  %v1372_v36 = vld [vmem:[#allocation7 + $0x470] sm:$0xff] }
 0x198   :  { %v2865_v21 = vpop.eup %2864 }
 0x199   :  { %2866 = vrcp.f32 %v1462_v20  ;;  %v1367_v20 = vld [vmem:[#allocation7 + $0x448] sm:$0xff] }
 0x1a6   :  { %v2867_v22 = vpop.eup %2866 }
 0x1a7   :  { %v1474_v23 = vmul.f32 %v2867_v22, %v2865_v21  ;;  %v1361_v22 = vld [vmem:[#allocation7 + $0x418] sm:$0xff] }
 0x1a9   :  { %v3061_v25 = vsub.f32 %v2865_v21, %v1474_v23  ;;  %v1366_v21 = vld [vmem:[#allocation7 + $0x440] sm:$0xff]  ;;  %v1360_v23 = vld [vmem:[#allocation7 + $0x410] sm:$0xff] }
 0x1ab   :  { %v1478_v27 = vpack.c.bf16 %v3061_v25, %v3061_v25  ;;  %1556 = vmatprep.mubr.f32.mxu1 %v3061_v25  ;;  %1627 = vmatprep.mubr.f32.mxu0 %v3061_v25 }
 0x1ac   :  { %1557 = vmatmul.mubr.f32.vlgmr.msra.gmra.mxu1 %v3047_v59  ;;  %1628 = vmatmul.mubr.f32.vlgmr.msra.gmra.mxu0 %v3047_v59 }
 0x1ad   :  { %1479 = vst [vmem:[#allocation3 + $0xc] sm:$0xf] %v1478_v27  ;;  %1635 = vmatpush1.msra.mxu1 %v1324_v26  ;;  %1698 = vmatprep.mubr.f32.mxu1 %v3061_v25  ;;  %v1355_v26 = vld [vmem:[#allocation7 + $0x3e8] sm:$0xff]  ;;  %v1354_v27 = vld [vmem:[#allocation7 + $0x3e0] sm:$0xff] }
 0x1ae   :  { %1636 = vmatprep.subr.mxu1 %v1319_v28  ;;  %v1349_v28 = vld [vmem:[#allocation7 + $0x3b8] sm:$0xff] }
 0x1af   :  { %1637 = vmatpush1.msra.mxu1 %v1318_v29  ;;  %v1348_v29 = vld [vmem:[#allocation7 + $0x3b0] sm:$0xff] }
 0x1b0   :  { %1638 = vmatprep.subr.mxu1 %v1313_v30  ;;  %v1343_v30 = vld [vmem:[#allocation7 + $0x388] sm:$0xff] }
 0x1b1   :  { %1639 = vmatpush1.msra.mxu1 %v1312_v32  ;;  %v1342_v32 = vld [vmem:[#allocation7 + $0x380] sm:$0xff] }
 0x1b2   :  { %1640 = vmatprep.subr.mxu1 %v1307_v33  ;;  %v1337_v33 = vld [vmem:[#allocation7 + $0x358] sm:$0xff] }
 0x1b3   :  { %1641 = vmatpush1.msra.mxu1 %v1306_v7  ;;  %v1336_v7 = vld [vmem:[#allocation7 + $0x350] sm:$0xff] }
 0x1b4   :  { %1642 = vmatprep.subr.mxu1 %v1301_v34  ;;  %v1331_v34 = vld [vmem:[#allocation7 + $0x328] sm:$0xff] }
 0x1b5   :  { %1643 = vmatpush1.msra.mxu1 %v1300_v35  ;;  %v1330_v35 = vld [vmem:[#allocation7 + $0x320] sm:$0xff] }
 0x1b6   :  { %1644 = vmatprep.subr.mxu1 %v1295_v37  ;;  %v2811_v37 = vld [vmem:[%s3237_s6 + $0x78] sm:$0xff]  }
 0x1b7   :  { %1645 = vmatpush1.msra.mxu1 %v1294_v38  ;;  %v2812_v38 = vld [vmem:[%s3237_s6 + $0x38] sm:$0xff]   ;;  %2486 = vmatprep.subr.bf16.mxu0 %v2811_v37 }
 0x1b8   :  { %1646 = vmatprep.subr.mxu1 %v1289_v39  ;;  %2487 = vmatpush3.bf16.msra.mxu0 %v2812_v38  ;;  %v2813_v39 = vld [vmem:[%s3237_s6 + $0x70] sm:$0xff]  }
 0x1b9   :  { %1647 = vmatpush1.msra.mxu1 %v1288_v40  ;;  %v2814_v40 = vld [vmem:[%s3237_s6 + $0x30] sm:$0xff]   ;;  %2488 = vmatprep.subr.bf16.mxu0 %v2813_v39 }
 0x1ba   :  { %1648 = vmatprep.subr.mxu1 %v1283_v41  ;;  %v2815_v41 = vld [vmem:[%s3237_s6 + $0x68] sm:$0xff]  }
 0x1bb   :  { %1649 = vmatpush1.msra.mxu1 %v1282_v42  ;;  %v2816_v42 = vld [vmem:[%s3237_s6 + $0x28] sm:$0xff]  }
 0x1bc   :  { %1650 = vmatprep.subr.mxu1 %v1277_v44  ;;  %2489 = vmatpush3.bf16.msra.mxu0 %v2814_v40  ;;  %v2817_v44 = vld [vmem:[%s3237_s6 + $0x60] sm:$0xff]  }
 0x1bd   :  { %1651 = vmatpush1.msra.mxu1 %v1276_v45  ;;  %2490 = vmatprep.subr.bf16.mxu0 %v2815_v41  ;;  %v2818_v45 = vld [vmem:[%s3237_s6 + $0x20] sm:$0xff]  }
 0x1be   :  { %1652 = vmatprep.subr.mxu1 %v1271_v46  ;;  %v2819_v46 = vld [vmem:[%s3237_s6 + $0x58] sm:$0xff]  }
 0x1bf   :  { %1653 = vmatpush1.msra.mxu1 %v1270_v47  ;;  %v2820_v47 = vld [vmem:[%s3237_s6 + $0x18] sm:$0xff]  }
 0x1c0   :  { %1654 = vmatprep.subr.mxu1 %v1265_v48  ;;  %2491 = vmatpush3.bf16.msra.mxu0 %v2816_v42  ;;  %v2821_v48 = vld [vmem:[%s3237_s6 + $0x50] sm:$0xff]  }
 0x1c1   :  { %1655 = vmatpush1.msra.mxu1 %v1264_v49  ;;  %2492 = vmatprep.subr.bf16.mxu0 %v2817_v44  ;;  %v2822_v49 = vld [vmem:[%s3237_s6 + $0x10] sm:$0xff]  }
 0x1c2   :  { %1656 = vmatprep.subr.mxu1 %v1259_v51  ;;  %v2823_v51 = vld [vmem:[%s3237_s6 + $0x48] sm:$0xff]  }
 0x1c3   :  { %1657 = vmatpush1.msra.mxu1 %v1258_v53  ;;  %v2824_v53 = vld [vmem:[%s3237_s6 + $0x8] sm:$0xff]  }
 0x1c4   :  { %1658 = vmatprep.subr.mxu1 %v1253_v54  ;;  %2493 = vmatpush3.bf16.msra.mxu0 %v2818_v45  ;;  %v2825_v54 = vld [vmem:[%s3237_s6 + $0x40] sm:$0xff]  }
 0x1c5   :  { %1659 = vmatpush1.msra.mxu1 %v1252_v56  ;;  %2494 = vmatprep.subr.bf16.mxu0 %v2819_v46  ;;  %v2826_v56 = vld [vmem:[%s3237_s6] sm:$0xff]  }
 0x1c6   :  { %1660 = vmatprep.subr.mxu1 %v1247_v57  ;;  %v2830_v57 = vld [vmem:[%s3236_s5 + $0x78] sm:$0xff]  }
 0x1c7   :  { %1661 = vmatpush1.msra.mxu1 %v1246_v58 }
 0x1c8   :  { %1662 = vmatprep.subr.mxu1 %v1241_v60  ;;  %2495 = vmatpush3.bf16.msra.mxu0 %v2820_v47 }
 0x1c9   :  { %1663 = vmatpush1.msra.mxu1 %v1240_v1  ;;  %2496 = vmatprep.subr.bf16.mxu0 %v2821_v48 }
 0x1ca   :  { %1664 = vmatprep.subr.mxu1 %v1235_v52 }
 0x1cb   :  { %1665 = vmatpush1.msra.mxu1 %v1234_v61 }
 0x1cc   :  { %1666 = vmatprep.subr.mxu1 %v1421_v62  ;;  %2497 = vmatpush3.bf16.msra.mxu0 %v2822_v49 }
 0x1cd   :  { %1667 = vmatpush2.msra.mxu1 %v1420_v63  ;;  %2498 = vmatprep.subr.bf16.mxu0 %v2823_v51  ;;  %v2833_v51 = vld [vmem:[%s3236_s5 + $0x38] sm:$0xff]  }
 0x1ce   :  { %1668 = vmatprep.subr.mxu1 %v1415_v0 }
 0x1cf   :  { %1669 = vmatpush2.msra.mxu1 %v1414_v2 }
 0x1d0   :  { %1670 = vmatprep.subr.mxu1 %v1409_v3  ;;  %2499 = vmatpush3.bf16.msra.mxu0 %v2824_v53 }
 0x1d1   :  { %1671 = vmatpush2.msra.mxu1 %v1408_v4  ;;  %2500 = vmatprep.subr.bf16.mxu0 %v2825_v54 }
 0x1d2   :  { %1672 = vmatprep.subr.mxu1 %v1403_v6 }
 0x1d3   :  { %1673 = vmatpush2.msra.mxu1 %v1402_v9 }
 0x1d4   :  { %1674 = vmatprep.subr.mxu1 %v1397_v10  ;;  %2501 = vmatpush3.bf16.msra.mxu0 %v2826_v56  ;;  %v2834_v56 = vld [vmem:[%s3236_s5 + $0x70] sm:$0xff]  }
 0x1d5   :  { %1675 = vmatpush2.msra.mxu1 %v1396_v11  ;;  %2508 = vmatprep.subr.bf16.mxu0 %v2830_v57  ;;  %v2835_v57 = vld [vmem:[%s3236_s5 + $0x30] sm:$0xff]  }
 0x1d6   :  { %1676 = vmatprep.subr.mxu1 %v1391_v12 }
 0x1d7   :  { %1677 = vmatpush2.msra.mxu1 %v1390_v13 }
 0x1d8   :  { %1678 = vmatprep.subr.mxu1 %v1385_v14 }
 0x1d9   :  { %1679 = vmatpush2.msra.mxu1 %v1384_v15 }
 0x1da   :  { %1680 = vmatprep.subr.mxu1 %v1379_v17 }
 0x1db   :  { %1681 = vmatpush2.msra.mxu1 %v1378_v18 }
 0x1dc   :  { %1682 = vmatprep.subr.mxu1 %v1373_v19 }
 0x1dd   :  { %1683 = vmatpush2.msra.mxu1 %v1372_v36 }
 0x1de   :  { %1684 = vmatprep.subr.mxu1 %v1367_v20 }
 0x1df   :  { %1685 = vmatpush2.msra.mxu1 %v1366_v21 }
 0x1e0   :  { %1686 = vmatprep.subr.mxu1 %v1361_v22 }
 0x1e1   :  { %1687 = vmatpush2.msra.mxu1 %v1360_v23 }
 0x1e2   :  { %1688 = vmatprep.subr.mxu1 %v1355_v26 }
 0x1e3   :  { %1689 = vmatpush2.msra.mxu1 %v1354_v27 }
 0x1e4   :  { %1690 = vmatprep.subr.mxu1 %v1349_v28 }
 0x1e5   :  { %1691 = vmatpush2.msra.mxu1 %v1348_v29 }
 0x1e6   :  { %1692 = vmatprep.subr.mxu1 %v1343_v30 }
 0x1e7   :  { %1693 = vmatpush2.msra.mxu1 %v1342_v32 }
 0x1e8   :  { %1694 = vmatprep.subr.mxu1 %v1337_v33 }
 0x1e9   :  { %1695 = vmatpush2.msra.mxu1 %v1336_v7 }
 0x1ea   :  { %1696 = vmatprep.subr.mxu1 %v1331_v34  ;;  %v1794_v34 = vld [vmem:[#allocation3 + $0x10] sm:$0x11] }
 0x1eb   :  { %1697 = vmatpush2.msra.mxu1 %v1330_v35  ;;  %v2449_v35 = vcombine.high %v1794_v34, %v1794_v34 }
 0x1ec   :  { %1699 = vmatmul.mubr.f32.vlgmr.msra.gmra.mxu1 %v3047_v59 }
 0x1ed   :  { %v1861_v37 = vshll.u32 %v2449_v35, 16 }
 0x1ef   :  { %v1863_v42 = vrot.slane %v1861_v37, 1 }
 0x26c   :  { %v1558_v58 = vpop.f32.mrf.mxu1  ;;  %v1629_v2 = vpop.f32.mrf.mxu0 }
 0x26d   :  { %v1705_v60 = vadd.f32 %v1558_v58, %v3033_v24  ;;  %v1719_v10 = vadd.f32 %v3040_v43, %v1629_v2  ;;  %v2836_v58 = vld [vmem:[%s3236_s5 + $0x68] sm:$0xff]  }
 0x26e   :  { %v1560_v52 = vpop.f32.mrf.mxu1  ;;  %v1631_v3 = vpop.f32.mrf.mxu0  ;;  %v2844_v2 = vld [vmem:[%s3236_s5 + $0x48] sm:$0xff]  }
 0x26f   :  { %v2442_v1 = vmul.f32 -1.442695, %v1705_v60  ;;  %v1712_v61 = vadd.f32 %v1560_v52, %v3035_v31  ;;  %v1726_v4 = vadd.f32 %v1631_v3, %v3043_v50  ;;  %v2837_v60 = vld [vmem:[%s3236_s5 + $0x28] sm:$0xff]   ;;  %v2839_v52 = vld [vmem:[%s3236_s5 + $0x20] sm:$0xff]  }
 0x270   :  { %v2845_v3 = vld [vmem:[%s3236_s5 + $0x8] sm:$0xff]  }
 0x271   :  { %2868 = vpow2.f32 %v2442_v1  ;;  %v2443_v62 = vmul.f32 -1.442695, %v1712_v61  ;;  %v2444_v6 = vmul.f32 -1.442695, %v1726_v4  ;;  %v2838_v1 = vld [vmem:[%s3236_s5 + $0x60] sm:$0xff]   ;;  %v2840_v61 = vld [vmem:[%s3236_s5 + $0x58] sm:$0xff]  }
 0x272   :  { %v2846_v4 = vld [vmem:[%s3236_s5 + $0x40] sm:$0xff]  }
 0x273   :  { %2870 = vpow2.f32 %v2443_v62  ;;  %v2841_v62 = vld [vmem:[%s3236_s5 + $0x18] sm:$0xff]  }
 0x27e   :  { %v2869_v63 = vpop.eup %2868 }
 0x27f   :  { %v1709_v0 = vadd.f32 1.0, %v2869_v63  ;;  %v2842_v63 = vld [vmem:[%s3236_s5 + $0x50] sm:$0xff]  }
 0x280   :  { %v2871_v9 = vpop.eup %2870 }
 0x281   :  { %2872 = vrcp.f32 %v1709_v0  ;;  %v1716_v13 = vadd.f32 1.0, %v2871_v9  ;;  %v2843_v0 = vld [vmem:[%s3236_s5 + $0x10] sm:$0xff]   ;;  %v2194_v9 = vld [vmem:[%s3239_s8 + $0x78] sm:$0xff] }
 0x282   :  { %2874 = vpow2.f32 %v2444_v6  ;;  %v2847_v6 = vld [vmem:[%s3236_s5] sm:$0xff]  }
 0x28e   :  { %v2873_v11 = vpop.eup %2872 }
 0x28f   :  { %v1720_v24 = vmul.f32 %v2873_v11, %v1719_v10  ;;  %v2875_v31 = vpop.eup %2874  ;;  %v2939_v10 = vmov 0.0   ;;  %v2193_v11 = vld [vmem:[%s3239_s8 + $0x70] sm:$0xff] }
 0x290   :  { %v1730_v14 = vadd.f32 1.0, %v2875_v31  ;;  %2547 = vmatprep.subr.mxu1 %v2939_v10  ;;  %v2189_v31 = vld [vmem:[%s3239_s8 + $0x50] sm:$0xff]  ;;  %2579 = vmatprep.mubr.msk.f32.mxu1 %vm2940_vm1, %v2939_v10 }
 0x291   :  { %v1721_v12 = vadd.f32 %v1720_v24, %v3045_v55  ;;  %2548 = vmatpush3.msra.mxu1 %v2194_v9  ;;  %v2192_v24 = vld [vmem:[%s3239_s8 + $0x68] sm:$0xff] }
 0x292   :  { %2549 = vmatprep.subr.mxu1 %v2939_v10 }
 0x293   :  { %2876 = vtanh.f32 %v1721_v12  ;;  %2550 = vmatpush3.msra.mxu1 %v2193_v11  ;;  %v2191_v12 = vld [vmem:[%s3239_s8 + $0x60] sm:$0xff] }
 0x294   :  { %2878 = vrcp.f32 %v1716_v13  ;;  %2551 = vmatprep.subr.mxu1 %v2939_v10  ;;  %v2190_v13 = vld [vmem:[%s3239_s8 + $0x58] sm:$0xff] }
 0x295   :  { %2880 = vrcp.f32 %v1730_v14  ;;  %2552 = vmatpush3.msra.mxu1 %v2192_v24  ;;  %v2188_v14 = vld [vmem:[%s3239_s8 + $0x48] sm:$0xff] }
 0x296   :  { %2553 = vmatprep.subr.mxu1 %v2939_v10 }
 0x297   :  { %2554 = vmatpush3.msra.mxu1 %v2191_v12 }
 0x298   :  { %2555 = vmatprep.subr.mxu1 %v2939_v10 }
 0x299   :  { %2556 = vmatpush3.msra.mxu1 %v2190_v13 }
 0x29a   :  { %2557 = vmatprep.subr.mxu1 %v2939_v10 }
 0x29b   :  { %2558 = vmatpush3.msra.mxu1 %v2189_v31 }
 0x29c   :  { %2559 = vmatprep.subr.mxu1 %v2939_v10 }
 0x29d   :  { %2560 = vmatpush3.msra.mxu1 %v2188_v14 }
 0x29e   :  { %2561 = vmatprep.subr.mxu1 %v2939_v10 }
 0x2a0   :  { %v2877_v15 = vpop.eup %2876 }
 0x2a1   :  { %v1723_v17 = vsub.f32 %v3047_v59, %v2877_v15  ;;  %v2879_v18 = vpop.eup %2878 }
 0x2a2   :  { %v2881_v23 = vpop.eup %2880 }
 0x2a3   :  { %v1724_v19 = vmul.f32 %v2879_v18, %v1723_v17  ;;  %v2186_v17 = vld [vmem:[%s3239_s8 + $0x38] sm:$0xff]  ;;  %v2185_v18 = vld [vmem:[%s3239_s8 + $0x30] sm:$0xff] }
 0x2a5   :  { %v1725_v50 = vadd.f32 %v2877_v15, %v1724_v19  ;;  %v2187_v15 = vld [vmem:[%s3239_s8 + $0x40] sm:$0xff]  ;;  %v2184_v19 = vld [vmem:[%s3239_s8 + $0x28] sm:$0xff] }
 0x2a6   :  { %2562 = vmatpush3.msra.mxu1 %v2187_v15 }
 0x2a7   :  { %v1747_v36 = vpack.c.bf16 %v1725_v50, %v1725_v50  ;;  %2563 = vmatprep.subr.mxu1 %v2939_v10  ;;  %v2183_v50 = vld [vmem:[%s3239_s8 + $0x20] sm:$0xff] }
 0x2a8   :  { %2564 = vmatpush3.msra.mxu1 %v2186_v17 }
 0x2a9   :  { %1751 = vst [vmem:[#allocation3 + $0x8] sm:$0xf] %v1747_v36  ;;  %2565 = vmatprep.subr.mxu1 %v2939_v10  ;;  %v2182_v36 = vld [vmem:[%s3239_s8 + $0x18] sm:$0xff] }
 0x2aa   :  { %2566 = vmatpush3.msra.mxu1 %v2185_v18 }
 0x2ab   :  { %2567 = vmatprep.subr.mxu1 %v2939_v10 }
 0x2ac   :  { %v1700_v43 = vpop.f32.mrf.mxu1  ;;  %2568 = vmatpush3.msra.mxu1 %v2184_v19 }
 0x2ad   :  { %v1733_v20 = vadd.f32 %v1700_v43, %v3051_v5  ;;  %2569 = vmatprep.subr.mxu1 %v2939_v10  ;;  %v2181_v43 = vld [vmem:[%s3239_s8 + $0x10] sm:$0xff] }
 0x2ae   :  { %v1702_v21 = vpop.f32.mrf.mxu1  ;;  %2570 = vmatpush3.msra.mxu1 %v2183_v50 }
 0x2af   :  { %v2445_v22 = vmul.f32 -1.442695, %v1733_v20  ;;  %v1740_v55 = vadd.f32 %v3058_v16, %v1702_v21  ;;  %v2448_v16 = vcombine.low %v1794_v34, %v1794_v34  ;;  %2571 = vmatprep.subr.mxu1 %v2939_v10  ;;  %v2180_v20 = vld [vmem:[%s3239_s8 + $0x8] sm:$0xff]  ;;  %v2179_v21 = vld [vmem:[%s3239_s8] sm:$0xff] }
 0x2b0   :  { %v2831_v40 = vld [vmem:[#allocation3] ss:$8 sps:$4 sm:$0xff]   ;;  %2572 = vmatpush3.msra.mxu1 %v2182_v36 }
 0x2b1   :  { %2882 = vpow2.f32 %v2445_v22  ;;  %v1741_v26 = vmul.f32 %v2881_v23, %v1740_v55  ;;  %v1849_v38 = vshll.u32 %v2448_v16, 16  ;;  %v1844_v41 = vshll.u32 %v2831_v40, 16  ;;  %2573 = vmatprep.subr.mxu1 %v2939_v10 }
 0x2b2   :  { %v1842_v47 = vshrl.u32 %v2831_v40, 16  ;;  %2574 = vmatpush3.msra.mxu1 %v2181_v43 }
 0x2b3   :  { %v1742_v27 = vadd.f32 %v1741_v26, %v3053_v8  ;;  %v1851_v44 = vrot.slane %v1849_v38, 1  ;;  %2575 = vmatprep.subr.mxu1 %v2939_v10 }
 0x2b4   :  { %2576 = vmatpush3.msra.mxu1 %v2180_v20 }
 0x2b5   :  { %2884 = vtanh.f32 %v1742_v27  ;;  %2577 = vmatprep.subr.mxu1 %v2939_v10 }
 0x2b6   :  { %2578 = vmatpush3.msra.mxu1 %v2179_v21 }
 0x2be   :  { %v2883_v59 = vpop.eup %2882 }
 0x2bf   :  { %v1737_v28 = vadd.f32 1.0, %v2883_v59  ;;  %v2162_v59 = vlaneseq }
 0x2c1   :  { %2886 = vrcp.f32 %v1737_v28 }
 0x2c2   :  { %v2885_v29 = vpop.eup %2884 }
 0x2c3   :  { %v1744_v30 = vsub.f32 %v3061_v25, %v2885_v29  ;;  %v1846_v25 = vrot.slane %v1844_v41, 1 }
 0x2c5   :  { %v1847_v49 = vor.u32 %v1846_v25, %v1842_v47 }
 0x2c7   :  { %v1852_v54 = vsel %vm1840_vm0, %v1847_v49, %v1851_v44 }
 0x2ce   :  { %v2887_v32 = vpop.eup %2886 }
 0x2cf   :  { %v1745_v33 = vmul.f32 %v2887_v32, %v1744_v30  ;;  %v2484_v32 = vld [vmem:[%s3238_s7] ss:$0 sm:$0xff] }
 0x2d1   :  { %v1746_v7 = vadd.f32 %v2885_v29, %v1745_v33  ;;  %v2163_v33 = vshrl.u32 %v2162_v59, 7 }
 0x2d3   :  { %v1752_v5 = vpack.c.bf16 %v1746_v7, %v1746_v7  ;;  %vm2164_vm2 = vcmp.ne.s32.totalorder %v2163_v33, 7 }
 0x2d5   :  { %1756 = vst [vmem:[#allocation3 + $0x4] sm:$0xf] %v1752_v5 }
 0x2dc   :  { %v2827_v39 = vld [vmem:[#allocation3 + $0x4] ss:$8 sps:$4 sm:$0xff]  }
 0x2dd   :  { %v1856_v8 = vshll.u32 %v2827_v39, 16  ;;  %v1854_v45 = vshrl.u32 %v2827_v39, 16 }
 0x2df   :  { %v1858_v46 = vrot.slane %v1856_v8, 1 }
 0x2e1   :  { %v1859_v48 = vor.u32 %v1858_v46, %v1854_v45 }
 0x2e3   :  { %v1864_v53 = vsel %vm1840_vm0, %v1859_v48, %v1863_v42 }
 0x2e4   :  { %1995 = vmatprep.mubr.bf16.mxu0 %v1864_v53 }
 0x2e5   :  { %1996 = vmatmul.mubr.bf16.vlgmr.msra.gmra.mxu0 %v1852_v54 }
 0x2e6   :  { %2509 = vmatpush3.bf16.msra.mxu0 %v2833_v51  ;;  %2142 = vmatprep.mubr.bf16.mxu0 %v2827_v39 }
 0x2e7   :  { %2510 = vmatprep.subr.bf16.mxu0 %v2834_v56 }
 0x2ea   :  { %2511 = vmatpush3.bf16.msra.mxu0 %v2835_v57 }
 0x2eb   :  { %2512 = vmatprep.subr.bf16.mxu0 %v2836_v58 }
 0x2ee   :  { %2513 = vmatpush3.bf16.msra.mxu0 %v2837_v60  ;;  %v2485_v60 = vld [vmem:[#allocation4] ss:$0 sm:$0xff] }
 0x2ef   :  { %2514 = vmatprep.subr.bf16.mxu0 %v2838_v1 }
 0x2f2   :  { %2515 = vmatpush3.bf16.msra.mxu0 %v2839_v52 }
 0x2f3   :  { %2516 = vmatprep.subr.bf16.mxu0 %v2840_v61 }
 0x2f6   :  { %2517 = vmatpush3.bf16.msra.mxu0 %v2841_v62 }
 0x2f7   :  { %2518 = vmatprep.subr.bf16.mxu0 %v2842_v63 }
 0x2fa   :  { %2519 = vmatpush3.bf16.msra.mxu0 %v2843_v0 }
 0x2fb   :  { %2520 = vmatprep.subr.bf16.mxu0 %v2844_v2 }
 0x2fe   :  { %2521 = vmatpush3.bf16.msra.mxu0 %v2845_v3 }
 0x2ff   :  { %2522 = vmatprep.subr.bf16.mxu0 %v2846_v4 }
 0x302   :  { %2523 = vmatpush3.bf16.msra.mxu0 %v2847_v6 }
 0x305   :  { %2143 = vmatmul.mubr.bf16.vlgmr.msra.gmra.mxu0 %v2831_v40 }
 0x3a5   :  { %v2502_v22 = vpop.f32.mrf.mxu0 }
 0x3a7   :  { %v2503_v55 = vpop.f32.mrf.mxu0 }
 0x3a8   :  { %v2504_v29 = vadd.f32 %v2503_v55, %v2502_v22 }
 0x3a9   :  { %v2505_v23 = vpop.f32.mrf.mxu0 }
 0x3ab   :  { %v2506_v26 = vpop.f32.mrf.mxu0 }
 0x3ac   :  { %v2507_v35 = vadd.f32 %v2506_v26, %v2505_v23 }
 0x3c5   :  { %v2524_v27 = vpop.f32.mrf.mxu0 }
 0x3c7   :  { %v2525_v28 = vpop.f32.mrf.mxu0 }
 0x3c8   :  { %v2526_v30 = vadd.f32 %v2525_v28, %v2524_v27 }
 0x3c9   :  { %v2527_v7 = vpop.f32.mrf.mxu0 }
 0x3ca   :  { %v2145_v5 = vadd.f32 %v2526_v30, %v2504_v29 }
 0x3cb   :  { %v2528_v34 = vpop.f32.mrf.mxu0 }
 0x3cc   :  { %v2158_v16 = vadd.f32 %v2484_v32, %v2145_v5  ;;  %v2529_v37 = vadd.f32 %v2528_v34, %v2527_v7 }
 0x3ce   :  { %v2160_v38 = vmax.f32 %v2158_v16, 0.0  ;;  %v2148_v39 = vadd.f32 %v2529_v37, %v2507_v35 }
 0x3d0   :  { %v2165_v40 = vsel %vm2164_vm2, %v2160_v38, 0.0  ;;  %v2159_v8 = vadd.f32 %v2484_v32, %v2148_v39 }
 0x3d1   :  { %v2167_v41 = vrot.slane %v2165_v40, 4 }
 0x3d2   :  { %v2161_v42 = vmax.f32 %v2159_v8, 0.0 }
 0x3d3   :  { %v2168_v44 = vmax.f32 %v2165_v40, %v2167_v41 }
 0x3d4   :  { %v2166_v45 = vsel %vm2164_vm2, %v2161_v42, 0.0 }
 0x3d5   :  { %v2169_v46 = vrot.slane %v2168_v44, 2  ;;  %v2173_v47 = vrot.slane %v2166_v45, 4 }
 0x3d7   :  { %v2174_v25 = vmax.f32 %v2166_v45, %v2173_v47  ;;  %v2170_v48 = vmax.f32 %v2168_v44, %v2169_v46 }
 0x3d9   :  { %v2175_v49 = vrot.slane %v2174_v25, 2  ;;  %v2171_v51 = vrot.slane %v2170_v48, 1 }
 0x3db   :  { %v2176_v53 = vmax.f32 %v2174_v25, %v2175_v49  ;;  %v2172_v56 = vmax.f32 %v2170_v48, %v2171_v51 }
 0x3dd   :  { %v2177_v54 = vrot.slane %v2176_v53, 1 }
 0x3df   :  { %v2178_v57 = vmax.f32 %v2176_v53, %v2177_v54 }
 0x3e1   :  { %v2205_v58 = vsel %vm2204_vm3, %v2178_v57, %v2172_v56 }
 0x3e2   :  { %2580 = vmatmul.mubr.f32.vlgmr.msra.gmra.mxu1 %v2205_v58 }
 0x4a2   :  { %v2273_v1 = vpop.f32.mrf.mxu1 }
 0x4a3   :  { %v2274_v52 = vadd.f32 %v2485_v60, %v2273_v1 }
 0x4a4   :  { %v2581_v61 = vpop.f32.mrf.mxu1 }
 0x4a5   :  { %2278 = vst.msk [vmem:[%s3241_s10] sm:$0x3] %vm2277_vm4, %v2274_v52 }
 0x4a6   :  { %2283 = vsyncpa [#allocation6], 1 }
 0x4a7   :  { %2284 = vsyncpa [#allocation8], 1 }

</bundles_post_ra>
